<compile_context>
chip_gen: v6e
topology: v6e:2x2x1
jax: 0.10.0
libtpu: 0.0.40
codegen_flags: <defaults>
</compile_context>

<pallas_src>
import functools

import jax
import jax.numpy as jnp
from jax import lax
from jax.experimental import pallas as pl
from jax.experimental.pallas import tpu as pltpu


def _conv_bn_image_kernel(x_ref, w_ref, b_ref, o_ref, *,
                          kh_taps, kw_taps, stride, dilation, hout, wout):
    # x_ref: (1, Hp, Wp, Cin)      whole padded image for this batch element
    # w_ref: (KH*KW, Cin, Coutp)   BN-scale-folded weight taps (VMEM resident)
    # b_ref: (1, Coutp)            folded BN shift
    # o_ref: (1, Hout, Wout, Coutp)
    coutp = o_ref.shape[-1]
    cin = x_ref.shape[-1]
    acc = jnp.zeros((hout * wout, coutp), jnp.float32)
    for kh in range(kh_taps):
        for kw in range(kw_taps):
            h0 = kh * dilation
            w0 = kw * dilation
            if stride == 1:
                win = x_ref[0, h0:h0 + hout, w0:w0 + wout, :]
            else:
                win = x_ref[0, pl.ds(h0, hout, stride), pl.ds(w0, wout, stride), :]
            lhs = win.reshape(hout * wout, cin)
            acc = acc + jnp.dot(lhs, w_ref[kh * kw_taps + kw],
                                preferred_element_type=jnp.float32)
    out = (acc + b_ref[...]).astype(o_ref.dtype)
    o_ref[0] = out.reshape(hout, wout, coutp)


def _conv_bn_row_kernel(*refs, kh_taps, kw_taps, stride, dilation, wout):
    # refs = (row_ref_0 .. row_ref_{KH-1}, w_ref, bias_ref, o_ref)
    #   row_ref_kh: (1, 1, Wp, Cin)      one padded input row (tap kh)
    #   w_ref:      (KH*KW, Cin, Coutp)  BN-scale-folded weight taps
    #   bias_ref:   (1, Coutp)           folded BN shift
    #   o_ref:      (1, 1, Wout, Coutp)
    row_refs = refs[:kh_taps]
    w_ref = refs[kh_taps]
    b_ref = refs[kh_taps + 1]
    o_ref = refs[kh_taps + 2]

    coutp = o_ref.shape[-1]
    acc = jnp.zeros((wout, coutp), jnp.float32)
    for kh in range(kh_taps):
        for kw in range(kw_taps):
            start = kw * dilation
            if stride == 1:
                lhs = row_refs[kh][0, 0, start:start + wout, :]
            else:
                lhs = row_refs[kh][0, 0, pl.ds(start, wout, stride), :]
            acc = acc + jnp.dot(lhs, w_ref[kh * kw_taps + kw],
                                preferred_element_type=jnp.float32)
    o_ref[0, 0] = (acc + b_ref[...]).astype(o_ref.dtype)


@functools.partial(jax.jit, static_argnames=("stride", "padding", "dilation", "eps"))
def basic_conv2d(x, weight, gamma, beta, running_mean, running_var,
                 *, stride=1, padding=0, dilation=1, eps=1e-5):
    """x: (N, Cin, H, W) NCHW; weight: (Cout, Cin, KH, KW) OIHW (PyTorch)."""
    N, Cin, H, W = x.shape
    Cout, _, KH, KW = weight.shape
    Hout = (H + 2 * padding - dilation * (KH - 1) - 1) // stride + 1
    Wout = (W + 2 * padding - dilation * (KW - 1) - 1) // stride + 1
    Hp, Wp = H + 2 * padding, W + 2 * padding

    # Lane-dense output channels (multiple of 128); padding sliced off at the end.
    Coutp = ((Cout + 127) // 128) * 128

    compute_dtype = jnp.bfloat16 if x.dtype == jnp.bfloat16 else jnp.float32
    itm = jnp.dtype(compute_dtype).itemsize
    out_itm = jnp.dtype(x.dtype).itemsize

    # ---- wrapper glue (memory movement only): NCHW -> padded NHWC ----
    x_nhwc = jnp.transpose(x, (0, 2, 3, 1))
    xp = jnp.pad(x_nhwc, ((0, 0), (padding, padding), (padding, padding), (0, 0)))
    xp = xp.astype(compute_dtype)

    # fold eval-mode BatchNorm into per-channel scale/shift; fold scale into W
    scale = (gamma.astype(jnp.float32) /
             jnp.sqrt(running_var.astype(jnp.float32) + eps))
    bias = beta.astype(jnp.float32) - running_mean.astype(jnp.float32) * scale

    # (Cout, Cin, KH, KW) -> (KH, KW, Cin, Cout) -> (KH*KW, Cin, Cout), scale folded
    w_taps = jnp.transpose(weight, (2, 3, 1, 0)).reshape(KH * KW, Cin, Cout)
    w_taps = w_taps.astype(jnp.float32) * scale[None, None, :]
    w_taps = jnp.pad(w_taps, ((0, 0), (0, 0), (0, Coutp - Cout))).astype(compute_dtype)
    bias_p = jnp.pad(bias, (0, Coutp - Cout)).reshape(1, Coutp)

    weight_bytes = KH * KW * Cin * Coutp * itm
    flops = 2 * N * Hout * Wout * KH * KW * Cin * Coutp
    vmem_limit = 32 * 1024 * 1024

    # Estimated VMEM for strategy A: double-buffered image in / tile out,
    # resident weights, plus the f32 accumulator and one window slab.
    image_vmem = (2 * Hp * Wp * Cin * itm
                  + 2 * Hout * Wout * Coutp * out_itm
                  + 2 * weight_bytes
                  + Hout * Wout * Coutp * 4
                  + Hout * Wout * Cin * 4
                  + Coutp * 4)
    VMEM_BUDGET = 20 * 1024 * 1024  # headroom under the 32 MiB scoped limit

    if image_vmem <= VMEM_BUDGET:
        # ---- Strategy A: whole padded image per grid step ----
        kernel = functools.partial(_conv_bn_image_kernel, kh_taps=KH, kw_taps=KW,
                                   stride=stride, dilation=dilation,
                                   hout=Hout, wout=Wout)
        cost = pl.CostEstimate(
            flops=flops, transcendentals=0,
            bytes_accessed=(N * Hp * Wp * Cin * itm          # input read once
                            + weight_bytes                   # resident weight
                            + Coutp * 4                      # bias
                            + N * Hout * Wout * Coutp * out_itm))
        out_nhwc = pl.pallas_call(
            kernel,
            out_shape=jax.ShapeDtypeStruct((N, Hout, Wout, Coutp), x.dtype),
            grid=(N,),
            in_specs=[pl.BlockSpec((1, Hp, Wp, Cin), lambda n: (n, 0, 0, 0)),
                      pl.BlockSpec((KH * KW, Cin, Coutp), lambda n: (0, 0, 0)),
                      pl.BlockSpec((1, Coutp), lambda n: (0, 0))],
            out_specs=pl.BlockSpec((1, Hout, Wout, Coutp), lambda n: (n, 0, 0, 0)),
            compiler_params=pltpu.CompilerParams(
                dimension_semantics=("parallel",),
                vmem_limit_bytes=vmem_limit),
            cost_estimate=cost,
        )(xp, w_taps, bias_p)
    else:
        # ---- Strategy B: one output row per grid step (large feature maps) ----
        kernel = functools.partial(_conv_bn_row_kernel, kh_taps=KH, kw_taps=KW,
                                   stride=stride, dilation=dilation, wout=Wout)
        cost = pl.CostEstimate(
            flops=flops, transcendentals=0,
            bytes_accessed=(KH * N * Hp * Wp * Cin * itm     # input rows (read ~KH x)
                            + weight_bytes
                            + Coutp * 4
                            + N * Hout * Wout * Coutp * out_itm))

        # One BlockSpec per kernel-row tap, all reading the SAME padded input array.
        in_specs = [
            pl.BlockSpec((1, 1, Wp, Cin),
                         lambda n, ho, kh=kh: (n, ho * stride + kh * dilation, 0, 0))
            for kh in range(KH)
        ]
        in_specs.append(pl.BlockSpec((KH * KW, Cin, Coutp), lambda n, ho: (0, 0, 0)))
        in_specs.append(pl.BlockSpec((1, Coutp), lambda n, ho: (0, 0)))

        out_nhwc = pl.pallas_call(
            kernel,
            out_shape=jax.ShapeDtypeStruct((N, Hout, Wout, Coutp), x.dtype),
            grid=(N, Hout),
            in_specs=in_specs,
            out_specs=pl.BlockSpec((1, 1, Wout, Coutp), lambda n, ho: (n, ho, 0, 0)),
            compiler_params=pltpu.CompilerParams(
                dimension_semantics=("parallel", "parallel"),
                vmem_limit_bytes=vmem_limit),
            cost_estimate=cost,
        )(*([xp] * KH), w_taps, bias_p)

    # drop channel padding, back to NCHW (module contract)
    out = out_nhwc[..., :Cout]
    return jnp.transpose(out, (0, 3, 1, 2))


if __name__ == "__main__":
    key = jax.random.PRNGKey(0)
    k1, k2, k3, k4, k5, k6 = jax.random.split(key, 6)

    # BasicConv2d(in_planes=4, out_planes=8, kernel_size=3, stride=1, padding=1)
    N, Cin, H, W = 2, 4, 16, 16
    Cout, KH, KW = 8, 3, 3
    stride, padding, dilation = 1, 1, 1
    eps = 1e-5

    x = jax.random.normal(k1, (N, Cin, H, W), jnp.float32)
    weight = jax.random.normal(k2, (Cout, Cin, KH, KW), jnp.float32) * 0.1
    gamma = 1.0 + 0.1 * jax.random.normal(k3, (Cout,), jnp.float32)
    beta = 0.1 * jax.random.normal(k4, (Cout,), jnp.float32)
    running_mean = 0.1 * jax.random.normal(k5, (Cout,), jnp.float32)
    running_var = jax.nn.softplus(jax.random.normal(k6, (Cout,), jnp.float32)) + 0.5

    out = basic_conv2d(x, weight, gamma, beta, running_mean, running_var,
                       stride=stride, padding=padding, dilation=dilation, eps=eps)
    out = jax.block_until_ready(out)

    # reference: lax conv + folded BN (eval mode)
    ref = lax.conv_general_dilated(
        x, weight, window_strides=(stride, stride),
        padding=((padding, padding), (padding, padding)),
        rhs_dilation=(dilation, dilation),
        dimension_numbers=("NCHW", "OIHW", "NCHW"),
        precision=lax.Precision.HIGHEST)
    s = gamma / jnp.sqrt(running_var + eps)
    b = beta - running_mean * s
    ref = ref * s[None, :, None, None] + b[None, :, None, None]

    assert out.shape == (N, Cout, H, W), out.shape
    assert jnp.allclose(out, ref, atol=1e-3, rtol=1e-3), float(jnp.max(jnp.abs(out - ref)))
    print("KERNEL_OK")
</pallas_src>

<mosaic_0001>
module attributes {stable_mosaic.version = 11 : i64} {
  func.func @_conv_bn_image_kernel(%arg0: i32, %arg1: memref<1x18x18x4xf32, #tpu.memory_space<vmem>>, %arg2: memref<9x4x128xf32, #tpu.memory_space<vmem>>, %arg3: memref<1x128xf32, #tpu.memory_space<vmem>>, %arg4: memref<1x16x16x128xf32, #tpu.memory_space<vmem>>) attributes {dimension_semantics = [#tpu.dimension_semantics<parallel>], iteration_bounds = array<i64: 2>, scalar_prefetch = 0 : i64, scratch_operands = 0 : i64, tpu.core_type = #tpu.core_type<tc>, window_params = [{transform_indices = @transform_0, window_bounds = array<i64: 1, 18, 18, 4>}, {pipeline_mode = #tpu.pipeline_mode<synchronous>, transform_indices = @transform_1, window_bounds = array<i64: 9, 4, 128>}, {pipeline_mode = #tpu.pipeline_mode<synchronous>, transform_indices = @transform_2, window_bounds = array<i64: 1, 128>}, {transform_indices = @transform_3, window_bounds = array<i64: 1, 16, 16, 128>}]} {
    %cst = arith.constant 0.000000e+00 : f32
    %0 = vector.broadcast %cst : f32 to vector<256x128xf32>
    %c0 = arith.constant 0 : index
    %c0_0 = arith.constant 0 : index
    %c0_1 = arith.constant 0 : index
    %c0_2 = arith.constant 0 : index
    %1 = vector.load %arg1[%c0, %c0_0, %c0_1, %c0_2] : memref<1x18x18x4xf32, #tpu.memory_space<vmem>>, vector<1x16x16x4xf32>
    %2 = vector.shape_cast %1 : vector<1x16x16x4xf32> to vector<16x16x4xf32>
    %3 = vector.shape_cast %2 : vector<16x16x4xf32> to vector<256x4xf32>
    %c0_3 = arith.constant 0 : index
    %c0_4 = arith.constant 0 : index
    %c0_5 = arith.constant 0 : index
    %4 = vector.load %arg2[%c0_3, %c0_4, %c0_5] : memref<9x4x128xf32, #tpu.memory_space<vmem>>, vector<1x4x128xf32>
    %5 = vector.shape_cast %4 : vector<1x4x128xf32> to vector<4x128xf32>
    %cst_6 = arith.constant dense<0.000000e+00> : vector<256x128xf32>
    %6 = tpu.matmul %3, %5, %cst_6 {dimension_numbers = #tpu.dot_dimension_numbers<[1], [0], [0], [1], [0, 0, 1, 1], [], []>} : vector<256x4xf32>, vector<4x128xf32>, vector<256x128xf32> -> vector<256x128xf32>
    %7 = arith.addf %0, %6 : vector<256x128xf32>
    %c0_7 = arith.constant 0 : index
    %c0_8 = arith.constant 0 : index
    %c1 = arith.constant 1 : index
    %c0_9 = arith.constant 0 : index
    %8 = vector.load %arg1[%c0_7, %c0_8, %c1, %c0_9] : memref<1x18x18x4xf32, #tpu.memory_space<vmem>>, vector<1x16x16x4xf32>
    %9 = vector.shape_cast %8 : vector<1x16x16x4xf32> to vector<16x16x4xf32>
    %10 = vector.shape_cast %9 : vector<16x16x4xf32> to vector<256x4xf32>
    %c1_10 = arith.constant 1 : index
    %c0_11 = arith.constant 0 : index
    %c0_12 = arith.constant 0 : index
    %11 = vector.load %arg2[%c1_10, %c0_11, %c0_12] : memref<9x4x128xf32, #tpu.memory_space<vmem>>, vector<1x4x128xf32>
    %12 = vector.shape_cast %11 : vector<1x4x128xf32> to vector<4x128xf32>
    %cst_13 = arith.constant dense<0.000000e+00> : vector<256x128xf32>
    %13 = tpu.matmul %10, %12, %cst_13 {dimension_numbers = #tpu.dot_dimension_numbers<[1], [0], [0], [1], [0, 0, 1, 1], [], []>} : vector<256x4xf32>, vector<4x128xf32>, vector<256x128xf32> -> vector<256x128xf32>
    %14 = arith.addf %7, %13 : vector<256x128xf32>
    %c0_14 = arith.constant 0 : index
    %c0_15 = arith.constant 0 : index
    %c2 = arith.constant 2 : index
    %c0_16 = arith.constant 0 : index
    %15 = vector.load %arg1[%c0_14, %c0_15, %c2, %c0_16] : memref<1x18x18x4xf32, #tpu.memory_space<vmem>>, vector<1x16x16x4xf32>
    %16 = vector.shape_cast %15 : vector<1x16x16x4xf32> to vector<16x16x4xf32>
    %17 = vector.shape_cast %16 : vector<16x16x4xf32> to vector<256x4xf32>
    %c2_17 = arith.constant 2 : index
    %c0_18 = arith.constant 0 : index
    %c0_19 = arith.constant 0 : index
    %18 = vector.load %arg2[%c2_17, %c0_18, %c0_19] : memref<9x4x128xf32, #tpu.memory_space<vmem>>, vector<1x4x128xf32>
    %19 = vector.shape_cast %18 : vector<1x4x128xf32> to vector<4x128xf32>
    %cst_20 = arith.constant dense<0.000000e+00> : vector<256x128xf32>
    %20 = tpu.matmul %17, %19, %cst_20 {dimension_numbers = #tpu.dot_dimension_numbers<[1], [0], [0], [1], [0, 0, 1, 1], [], []>} : vector<256x4xf32>, vector<4x128xf32>, vector<256x128xf32> -> vector<256x128xf32>
    %21 = arith.addf %14, %20 : vector<256x128xf32>
    %c0_21 = arith.constant 0 : index
    %c1_22 = arith.constant 1 : index
    %c0_23 = arith.constant 0 : index
    %c0_24 = arith.constant 0 : index
    %22 = vector.load %arg1[%c0_21, %c1_22, %c0_23, %c0_24] : memref<1x18x18x4xf32, #tpu.memory_space<vmem>>, vector<1x16x16x4xf32>
    %23 = vector.shape_cast %22 : vector<1x16x16x4xf32> to vector<16x16x4xf32>
    %24 = vector.shape_cast %23 : vector<16x16x4xf32> to vector<256x4xf32>
    %c3 = arith.constant 3 : index
    %c0_25 = arith.constant 0 : index
    %c0_26 = arith.constant 0 : index
    %25 = vector.load %arg2[%c3, %c0_25, %c0_26] : memref<9x4x128xf32, #tpu.memory_space<vmem>>, vector<1x4x128xf32>
    %26 = vector.shape_cast %25 : vector<1x4x128xf32> to vector<4x128xf32>
    %cst_27 = arith.constant dense<0.000000e+00> : vector<256x128xf32>
    %27 = tpu.matmul %24, %26, %cst_27 {dimension_numbers = #tpu.dot_dimension_numbers<[1], [0], [0], [1], [0, 0, 1, 1], [], []>} : vector<256x4xf32>, vector<4x128xf32>, vector<256x128xf32> -> vector<256x128xf32>
    %28 = arith.addf %21, %27 : vector<256x128xf32>
    %c0_28 = arith.constant 0 : index
    %c1_29 = arith.constant 1 : index
    %c1_30 = arith.constant 1 : index
    %c0_31 = arith.constant 0 : index
    %29 = vector.load %arg1[%c0_28, %c1_29, %c1_30, %c0_31] : memref<1x18x18x4xf32, #tpu.memory_space<vmem>>, vector<1x16x16x4xf32>
    %30 = vector.shape_cast %29 : vector<1x16x16x4xf32> to vector<16x16x4xf32>
    %31 = vector.shape_cast %30 : vector<16x16x4xf32> to vector<256x4xf32>
    %c4 = arith.constant 4 : index
    %c0_32 = arith.constant 0 : index
    %c0_33 = arith.constant 0 : index
    %32 = vector.load %arg2[%c4, %c0_32, %c0_33] : memref<9x4x128xf32, #tpu.memory_space<vmem>>, vector<1x4x128xf32>
    %33 = vector.shape_cast %32 : vector<1x4x128xf32> to vector<4x128xf32>
    %cst_34 = arith.constant dense<0.000000e+00> : vector<256x128xf32>
    %34 = tpu.matmul %31, %33, %cst_34 {dimension_numbers = #tpu.dot_dimension_numbers<[1], [0], [0], [1], [0, 0, 1, 1], [], []>} : vector<256x4xf32>, vector<4x128xf32>, vector<256x128xf32> -> vector<256x128xf32>
    %35 = arith.addf %28, %34 : vector<256x128xf32>
    %c0_35 = arith.constant 0 : index
    %c1_36 = arith.constant 1 : index
    %c2_37 = arith.constant 2 : index
    %c0_38 = arith.constant 0 : index
    %36 = vector.load %arg1[%c0_35, %c1_36, %c2_37, %c0_38] : memref<1x18x18x4xf32, #tpu.memory_space<vmem>>, vector<1x16x16x4xf32>
    %37 = vector.shape_cast %36 : vector<1x16x16x4xf32> to vector<16x16x4xf32>
    %38 = vector.shape_cast %37 : vector<16x16x4xf32> to vector<256x4xf32>
    %c5 = arith.constant 5 : index
    %c0_39 = arith.constant 0 : index
    %c0_40 = arith.constant 0 : index
    %39 = vector.load %arg2[%c5, %c0_39, %c0_40] : memref<9x4x128xf32, #tpu.memory_space<vmem>>, vector<1x4x128xf32>
    %40 = vector.shape_cast %39 : vector<1x4x128xf32> to vector<4x128xf32>
    %cst_41 = arith.constant dense<0.000000e+00> : vector<256x128xf32>
    %41 = tpu.matmul %38, %40, %cst_41 {dimension_numbers = #tpu.dot_dimension_numbers<[1], [0], [0], [1], [0, 0, 1, 1], [], []>} : vector<256x4xf32>, vector<4x128xf32>, vector<256x128xf32> -> vector<256x128xf32>
    %42 = arith.addf %35, %41 : vector<256x128xf32>
    %c0_42 = arith.constant 0 : index
    %c2_43 = arith.constant 2 : index
    %c0_44 = arith.constant 0 : index
    %c0_45 = arith.constant 0 : index
    %43 = vector.load %arg1[%c0_42, %c2_43, %c0_44, %c0_45] : memref<1x18x18x4xf32, #tpu.memory_space<vmem>>, vector<1x16x16x4xf32>
    %44 = vector.shape_cast %43 : vector<1x16x16x4xf32> to vector<16x16x4xf32>
    %45 = vector.shape_cast %44 : vector<16x16x4xf32> to vector<256x4xf32>
    %c6 = arith.constant 6 : index
    %c0_46 = arith.constant 0 : index
    %c0_47 = arith.constant 0 : index
    %46 = vector.load %arg2[%c6, %c0_46, %c0_47] : memref<9x4x128xf32, #tpu.memory_space<vmem>>, vector<1x4x128xf32>
    %47 = vector.shape_cast %46 : vector<1x4x128xf32> to vector<4x128xf32>
    %cst_48 = arith.constant dense<0.000000e+00> : vector<256x128xf32>
    %48 = tpu.matmul %45, %47, %cst_48 {dimension_numbers = #tpu.dot_dimension_numbers<[1], [0], [0], [1], [0, 0, 1, 1], [], []>} : vector<256x4xf32>, vector<4x128xf32>, vector<256x128xf32> -> vector<256x128xf32>
    %49 = arith.addf %42, %48 : vector<256x128xf32>
    %c0_49 = arith.constant 0 : index
    %c2_50 = arith.constant 2 : index
    %c1_51 = arith.constant 1 : index
    %c0_52 = arith.constant 0 : index
    %50 = vector.load %arg1[%c0_49, %c2_50, %c1_51, %c0_52] : memref<1x18x18x4xf32, #tpu.memory_space<vmem>>, vector<1x16x16x4xf32>
    %51 = vector.shape_cast %50 : vector<1x16x16x4xf32> to vector<16x16x4xf32>
    %52 = vector.shape_cast %51 : vector<16x16x4xf32> to vector<256x4xf32>
    %c7 = arith.constant 7 : index
    %c0_53 = arith.constant 0 : index
    %c0_54 = arith.constant 0 : index
    %53 = vector.load %arg2[%c7, %c0_53, %c0_54] : memref<9x4x128xf32, #tpu.memory_space<vmem>>, vector<1x4x128xf32>
    %54 = vector.shape_cast %53 : vector<1x4x128xf32> to vector<4x128xf32>
    %cst_55 = arith.constant dense<0.000000e+00> : vector<256x128xf32>
    %55 = tpu.matmul %52, %54, %cst_55 {dimension_numbers = #tpu.dot_dimension_numbers<[1], [0], [0], [1], [0, 0, 1, 1], [], []>} : vector<256x4xf32>, vector<4x128xf32>, vector<256x128xf32> -> vector<256x128xf32>
    %56 = arith.addf %49, %55 : vector<256x128xf32>
    %c0_56 = arith.constant 0 : index
    %c2_57 = arith.constant 2 : index
    %c2_58 = arith.constant 2 : index
    %c0_59 = arith.constant 0 : index
    %57 = vector.load %arg1[%c0_56, %c2_57, %c2_58, %c0_59] : memref<1x18x18x4xf32, #tpu.memory_space<vmem>>, vector<1x16x16x4xf32>
    %58 = vector.shape_cast %57 : vector<1x16x16x4xf32> to vector<16x16x4xf32>
    %59 = vector.shape_cast %58 : vector<16x16x4xf32> to vector<256x4xf32>
    %c8 = arith.constant 8 : index
    %c0_60 = arith.constant 0 : index
    %c0_61 = arith.constant 0 : index
    %60 = vector.load %arg2[%c8, %c0_60, %c0_61] : memref<9x4x128xf32, #tpu.memory_space<vmem>>, vector<1x4x128xf32>
    %61 = vector.shape_cast %60 : vector<1x4x128xf32> to vector<4x128xf32>
    %cst_62 = arith.constant dense<0.000000e+00> : vector<256x128xf32>
    %62 = tpu.matmul %59, %61, %cst_62 {dimension_numbers = #tpu.dot_dimension_numbers<[1], [0], [0], [1], [0, 0, 1, 1], [], []>} : vector<256x4xf32>, vector<4x128xf32>, vector<256x128xf32> -> vector<256x128xf32>
    %63 = arith.addf %56, %62 : vector<256x128xf32>
    %c0_63 = arith.constant 0 : index
    %c0_64 = arith.constant 0 : index
    %64 = vector.load %arg3[%c0_63, %c0_64] : memref<1x128xf32, #tpu.memory_space<vmem>>, vector<1x128xf32>
    %65 = vector.broadcast %64 : vector<1x128xf32> to vector<256x128xf32>
    %66 = arith.addf %63, %65 : vector<256x128xf32>
    %67 = vector.shape_cast %66 : vector<256x128xf32> to vector<16x16x128xf32>
    %c0_65 = arith.constant 0 : index
    %c0_66 = arith.constant 0 : index
    %c0_67 = arith.constant 0 : index
    %c0_68 = arith.constant 0 : index
    %68 = vector.load %arg4[%c0_65, %c0_66, %c0_67, %c0_68] : memref<1x16x16x128xf32, #tpu.memory_space<vmem>>, vector<1x16x16x128xf32>
    %69 = vector.shape_cast %68 : vector<1x16x16x128xf32> to vector<16x16x128xf32>
    %70 = vector.shape_cast %67 : vector<16x16x128xf32> to vector<1x16x16x128xf32>
    tpu.vector_store %arg4[%c0_65, %c0_66, %c0_67, %c0_68], %70 {strides = array<i32>} : memref<1x16x16x128xf32, #tpu.memory_space<vmem>>, vector<1x16x16x128xf32>,
    return
  }
  func.func @transform_0(%arg0: i32) -> (i32, i32, i32, i32) {
    %c0_i32 = arith.constant 0 : i32
    %c0_i32_0 = arith.constant 0 : i32
    %c0_i32_1 = arith.constant 0 : i32
    %c0_i32_2 = arith.constant 0 : i32
    return %arg0, %c0_i32, %c0_i32_0, %c0_i32_1 : i32, i32, i32, i32
  }
  func.func @transform_1(%arg0: i32) -> (i32, i32, i32) {
    %c0_i32 = arith.constant 0 : i32
    %c0_i32_0 = arith.constant 0 : i32
    %c0_i32_1 = arith.constant 0 : i32
    %c0_i32_2 = arith.constant 0 : i32
    return %c0_i32, %c0_i32_0, %c0_i32_1 : i32, i32, i32
  }
  func.func @transform_2(%arg0: i32) -> (i32, i32) {
    %c0_i32 = arith.constant 0 : i32
    %c0_i32_0 = arith.constant 0 : i32
    %c0_i32_1 = arith.constant 0 : i32
    return %c0_i32, %c0_i32_0 : i32, i32
  }
  func.func @transform_3(%arg0: i32) -> (i32, i32, i32, i32) {
    %c0_i32 = arith.constant 0 : i32
    %c0_i32_0 = arith.constant 0 : i32
    %c0_i32_1 = arith.constant 0 : i32
    %c0_i32_2 = arith.constant 0 : i32
    return %arg0, %c0_i32, %c0_i32_0, %c0_i32_1 : i32, i32, i32, i32
  }
}

</mosaic_0001>

<bundles_post_ra>
// kernel: basic_conv2d.1
= control target key start
LH: loop header
LB: loop body
LE: loop exit
PB: predicated region body
PF: predicated region fallthrough
CT: control target
= control target key end

     0   :  { %s5041_s12 = smov 0   ;;  %s6544_s0 = inlined_call_operand.vmem [shape: f32[2,18,18,4], index: 0, kind: input, shape index: {}]   ;;  %s6545_s1 = inlined_call_operand.vmem [shape: f32[9,4,128], index: 1, kind: input, shape index: {}]   ;;  %s6546_s2 = inlined_call_operand.vmem [shape: f32[1,128], index: 2, kind: input, shape index: {}]   ;;  %s6547_s3 = inlined_call_operand.vmem [shape: f32[2,16,16,128], index: 3, kind: output, shape index: {}]  }
   0x1 LB: > { %s3746_s13 = sadd.s32 4294967295, %s5019_s12   ;;  %p3750_p0 = scmp.ge.s32.totalorder %s5019_s12, 1  ;;  %s5019_s12 = sphi %s5041_s12, %s13_s12  }
   0x2   : > { %p137_p1 = scmp.lt.s32.totalorder %s5019_s12, 3 }
   0x4   : > { %p138_p2 = pnand %p3750_p0, %p137_p1 }
   0x6   : > { %141 = sbr.rel (%p138_p2) target bundleno = 506 (0x1fa), region = 32 }
   0xb   : > { %v3754_v0 = vld [vmem:[%s6545_s1 + $0x4] sm:$0xf]  ;;  %vm335_vm0 = vcmask 1043456   ;;  %p161_p3 = scmp.lt.s32.totalorder %s3746_s13, 1  ;;  %v203_v1 = vld [vmem:[%s6545_s1] sm:$0xf] }
   0xc   : > { %5002 = vmatprep.subr.msk.mxu1 %vm335_vm0, %v3754_v0  ;;  %4552 = vmatprep.subr.msk.mxu0 %vm335_vm0, %v3754_v0  ;;  %v3821_v2 = vld [vmem:[%s6545_s1 + $0x8] sm:$0xf]  ;;  %vm238_vm1 = vcmask 31744   ;;  %v5095_v9 = vld [vmem:[%s6545_s1 + $0xc] sm:$0xf] }
   0xd   : > { %5003 = vmatpush3.msk.msra.mxu1 %vm335_vm0, %v3754_v0  ;;  %4553 = vmatpush3.msk.msra.mxu0 %vm335_vm0, %v3754_v0  ;;  %s6775_s13 = smov (!%p161_p3, %s3746_s13), 1  ;;  %v5100_v10 = vld [vmem:[%s6545_s1 + $0x10] sm:$0xf]  ;;  %v5259_v43 = vld [vmem:[%s6545_s1 + $0x14] sm:$0xf] }
   0xe   : > { %4602 = vmatprep.subr.msk.mxu1 %vm335_vm0, %v203_v1  ;;  %4652 = vmatprep.subr.msk.mxu0 %vm335_vm0, %v3821_v2  ;;  %s5004_s20 = smul.u32 432, %s6775_s13  ;;  %v5264_v44 = vld [vmem:[%s6545_s1 + $0x18] sm:$0xf]  ;;  %s4254_s9 = sshll.u32 %s6775_s13, 8 }
   0xf   : > { %s6394_s13 = scalar_lea.vmem %s6547_s3, %s4254_s9 }
  0x10   : > { %s5070_s23 = scalar_lea.vmem %s6544_s0, %s5004_s20 }
  0x11   : > { %v204_v3 = vld [vmem:[%s5070_s23 + $0x1] sm:$0xff]  ;;  %v205_v5 = vld [vmem:[%s5070_s23 + $0x9] sm:$0xff]  ;;  %v5084_v7 = vld [vmem:[%s5070_s23 + $0x19] sm:$0xff] }
  0x12   : > { %v5074_v4 = vld [vmem:[%s5070_s23 + $0xc1] sm:$0xff]  ;;  %4554 = vmatprep.mubr.msk.f32.mxu0 %vm238_vm1, %v204_v3  ;;  %v5081_v6 = vld [vmem:[%s5070_s23 + $0xc9] sm:$0xff]  ;;  %v5087_v8 = vld [vmem:[%s5070_s23 + $0xd9] sm:$0xff] }
  0x13   : > { %4578 = vmatprep.mubr.msk.f32.mxu1 %vm238_vm1, %v5074_v4  ;;  %4555 = vmatmul.mubr.msk.f32.vlgmr.msra.gmra.mxu0 %vm238_vm1, %v205_v5  ;;  %v5105_v11 = vld [vmem:[%s5070_s23 + $0x21] sm:$0xff]  ;;  %v5115_v13 = vld [vmem:[%s5070_s23 + $0x31] sm:$0xff]  ;;  %v5133_v15 = vld [vmem:[%s5070_s23 + $0x39] sm:$0xff] }
  0x14   : > { %4579 = vmatmul.mubr.msk.f32.vlgmr.msra.gmra.mxu1 %vm238_vm1, %v5081_v6  ;;  %4653 = vmatpush3.msk.msra.mxu0 %vm335_vm0, %v3821_v2  ;;  %v5108_v12 = vld [vmem:[%s5070_s23 + $0xe1] sm:$0xff]  ;;  %v5118_v14 = vld [vmem:[%s5070_s23 + $0xf1] sm:$0xff]  ;;  %v5136_v16 = vld [vmem:[%s5070_s23 + $0xf9] sm:$0xff] }
  0x15   : > { %4603 = vmatpush3.msk.msra.mxu1 %vm335_vm0, %v203_v1  ;;  %4557 = vmatprep.mubr.msk.f32.mxu0 %vm238_vm1, %v5084_v7  ;;  %v5139_v17 = vld [vmem:[%s5070_s23 + $0x49] sm:$0xff]  ;;  %v5153_v19 = vld [vmem:[%s5070_s23 + $0x51] sm:$0xff]  ;;  %v5159_v21 = vld [vmem:[%s5070_s23 + $0x61] sm:$0xff] }
  0x16   : > { %4581 = vmatprep.mubr.msk.f32.mxu1 %vm238_vm1, %v5087_v8  ;;  %4702 = vmatprep.subr.msk.mxu1 %vm335_vm0, %v5095_v9  ;;  %v5142_v18 = vld [vmem:[%s5070_s23 + $0x109] sm:$0xff]  ;;  %v5156_v20 = vld [vmem:[%s5070_s23 + $0x111] sm:$0xff]  ;;  %v5162_v22 = vld [vmem:[%s5070_s23 + $0x121] sm:$0xff] }
  0x17   : > { %4752 = vmatprep.subr.msk.mxu0 %vm335_vm0, %v5100_v10  ;;  %4558 = vmatmul.mubr.msk.f32.gmra.mxu0 %vm238_vm1, %v5105_v11  ;;  %v5173_v23 = vld [vmem:[%s5070_s23 + $0x69] sm:$0xff]  ;;  %v5179_v25 = vld [vmem:[%s5070_s23 + $0x79] sm:$0xff]  ;;  %v5193_v27 = vld [vmem:[%s5070_s23 + $0x81] sm:$0xff] }
  0x18   : > { %4582 = vmatmul.mubr.msk.f32.gmra.mxu1 %vm238_vm1, %v5108_v12  ;;  %4560 = vmatprep.mubr.msk.f32.mxu0 %vm238_vm1, %v5115_v13  ;;  %v5176_v24 = vld [vmem:[%s5070_s23 + $0x129] sm:$0xff]  ;;  %v5182_v26 = vld [vmem:[%s5070_s23 + $0x139] sm:$0xff]  ;;  %v5196_v28 = vld [vmem:[%s5070_s23 + $0x141] sm:$0xff] }
  0x19   : > { %4584 = vmatprep.mubr.msk.f32.mxu1 %vm238_vm1, %v5118_v14  ;;  %v5199_v29 = vld [vmem:[%s5070_s23 + $0x91] sm:$0xff]  ;;  %v5213_v31 = vld [vmem:[%s5070_s23 + $0x99] sm:$0xff]  ;;  %v5219_v33 = vld [vmem:[%s5070_s23 + $0xa9] sm:$0xff] }
  0x1a   : > { %v5202_v30 = vld [vmem:[%s5070_s23 + $0x151] sm:$0xff]  ;;  %v5216_v32 = vld [vmem:[%s5070_s23 + $0x159] sm:$0xff]  ;;  %v5222_v34 = vld [vmem:[%s5070_s23 + $0x169] sm:$0xff] }
  0x1b   : > { %4561 = vmatmul.mubr.msk.f32.gmra.mxu0 %vm238_vm1, %v5133_v15  ;;  %v5233_v35 = vld [vmem:[%s5070_s23 + $0xb1] sm:$0xff]  ;;  %v171_v37 = vld [vmem:[%s5070_s23] sm:$0xff]  ;;  %v172_v39 = vld [vmem:[%s5070_s23 + $0x8] sm:$0xff] }
  0x1c   : > { %4585 = vmatmul.mubr.msk.f32.gmra.mxu1 %vm238_vm1, %v5136_v16  ;;  %4563 = vmatprep.mubr.msk.f32.mxu0 %vm238_vm1, %v5139_v17  ;;  %v5236_v36 = vld [vmem:[%s5070_s23 + $0x171] sm:$0xff]  ;;  %v888_v38 = vld [vmem:[%s5070_s23 + $0x2] sm:$0xff]  ;;  %v5252_v42 = vld [vmem:[%s5070_s23 + $0x1a] sm:$0xff] }
  0x1d   : > { %4587 = vmatprep.mubr.msk.f32.mxu1 %vm238_vm1, %v5142_v18  ;;  %6608 = vst [vmem:[#allocation2_spill] sm:$0xff] %v5236_v36  ;;  %v889_v40 = vld [vmem:[%s5070_s23 + $0xa] sm:$0xff]  ;;  %v5249_v41 = vld [vmem:[%s5070_s23 + $0x18] sm:$0xff]  ;;  %6609 = vst [vmem:[#allocation3_spill] sm:$0xff] %v5252_v42 }
  0x1e   : > { %v5271_v45 = vld [vmem:[%s5070_s23 + $0x20] sm:$0xff]  ;;  %v5281_v47 = vld [vmem:[%s5070_s23 + $0x30] sm:$0xff]  ;;  %v5299_v49 = vld [vmem:[%s5070_s23 + $0x38] sm:$0xff] }
  0x1f   : > { %4564 = vmatmul.mubr.msk.f32.gmra.mxu0 %vm238_vm1, %v5153_v19  ;;  %v5274_v46 = vld [vmem:[%s5070_s23 + $0x22] sm:$0xff]  ;;  %v5284_v48 = vld [vmem:[%s5070_s23 + $0x32] sm:$0xff]  ;;  %v5302_v50 = vld [vmem:[%s5070_s23 + $0x3a] sm:$0xff] }
  0x20   : > { %4588 = vmatmul.mubr.msk.f32.gmra.mxu1 %vm238_vm1, %v5156_v20  ;;  %4566 = vmatprep.mubr.msk.f32.mxu0 %vm238_vm1, %v5159_v21  ;;  %6610 = vst [vmem:[#allocation4_spill] sm:$0xff] %v5274_v46  ;;  %6611 = vst [vmem:[#allocation5_spill] sm:$0xff] %v5284_v48  ;;  %v5305_v51 = vld [vmem:[%s5070_s23 + $0x48] sm:$0xff]  ;;  %v5319_v53 = vld [vmem:[%s5070_s23 + $0x50] sm:$0xff] }
  0x21   : > { %4590 = vmatprep.mubr.msk.f32.mxu1 %vm238_vm1, %v5162_v22  ;;  %6612 = vst [vmem:[#allocation6_spill] sm:$0xff] %v5302_v50  ;;  %v5308_v52 = vld [vmem:[%s5070_s23 + $0x4a] sm:$0xff]  ;;  %v5322_v54 = vld [vmem:[%s5070_s23 + $0x52] sm:$0xff]  ;;  %v5325_v55 = vld [vmem:[%s5070_s23 + $0x60] sm:$0xff] }
  0x22   : > { %6613 = vst [vmem:[#allocation7_spill] sm:$0xff] %v5308_v52  ;;  %6614 = vst [vmem:[#allocation8_spill] sm:$0xff] %v5322_v54  ;;  %v5328_v56 = vld [vmem:[%s5070_s23 + $0x62] sm:$0xff]  ;;  %v5342_v58 = vld [vmem:[%s5070_s23 + $0x6a] sm:$0xff] }
  0x23   : > { %4567 = vmatmul.mubr.msk.f32.gmra.mxu0 %vm238_vm1, %v5173_v23  ;;  %6615 = vst [vmem:[#allocation9_spill] sm:$0xff] %v5328_v56  ;;  %v5339_v57 = vld [vmem:[%s5070_s23 + $0x68] sm:$0xff]  ;;  %6616 = vst [vmem:[#allocation10_spill] sm:$0xff] %v5342_v58  ;;  %v5345_v59 = vld [vmem:[%s5070_s23 + $0x78] sm:$0xff] }
  0x24   : > { %4591 = vmatmul.mubr.msk.f32.gmra.mxu1 %vm238_vm1, %v5176_v24  ;;  %4569 = vmatprep.mubr.msk.f32.mxu0 %vm238_vm1, %v5179_v25  ;;  %v5348_v60 = vld [vmem:[%s5070_s23 + $0x7a] sm:$0xff]  ;;  %v5362_v62 = vld [vmem:[%s5070_s23 + $0x82] sm:$0xff]  ;;  %v5365_v63 = vld [vmem:[%s5070_s23 + $0x90] sm:$0xff] }
  0x25   : > { %4593 = vmatprep.mubr.msk.f32.mxu1 %vm238_vm1, %v5182_v26  ;;  %6617 = vst [vmem:[#allocation11_spill] sm:$0xff] %v5348_v60  ;;  %v5359_v61 = vld [vmem:[%s5070_s23 + $0x80] sm:$0xff]  ;;  %6618 = vst [vmem:[#allocation12_spill] sm:$0xff] %v5362_v62  ;;  %v5368_v0 = vld [vmem:[%s5070_s23 + $0x92] sm:$0xff] }
  0x26   : > { %6619 = vst [vmem:[#allocation13_spill] sm:$0xff] %v5368_v0  ;;  %v5379_v1 = vld [vmem:[%s5070_s23 + $0x98] sm:$0xff]  ;;  %v5385_v3 = vld [vmem:[%s5070_s23 + $0xa8] sm:$0xff] }
  0x27   : > { %4570 = vmatmul.mubr.msk.f32.gmra.mxu0 %vm238_vm1, %v5193_v27  ;;  %v5382_v2 = vld [vmem:[%s5070_s23 + $0x9a] sm:$0xff]  ;;  %v5388_v5 = vld [vmem:[%s5070_s23 + $0xaa] sm:$0xff] }
  0x28   : > { %4594 = vmatmul.mubr.msk.f32.gmra.mxu1 %vm238_vm1, %v5196_v28  ;;  %4572 = vmatprep.mubr.msk.f32.mxu0 %vm238_vm1, %v5199_v29  ;;  %6620 = vst [vmem:[#allocation14_spill] sm:$0xff] %v5382_v2  ;;  %6621 = vst [vmem:[#allocation15_spill] sm:$0xff] %v5388_v5 }
  0x29   : > { %4596 = vmatprep.mubr.msk.f32.mxu1 %vm238_vm1, %v5202_v30 }
  0x2b   : > { %4573 = vmatmul.mubr.msk.f32.gmra.mxu0 %vm238_vm1, %v5213_v31 }
  0x2c   : > { %4597 = vmatmul.mubr.msk.f32.gmra.mxu1 %vm238_vm1, %v5216_v32  ;;  %4575 = vmatprep.mubr.msk.f32.mxu0 %vm238_vm1, %v5219_v33 }
  0x2d   : > { %4599 = vmatprep.mubr.msk.f32.mxu1 %vm238_vm1, %v5222_v34 }
  0x2f   : > { %4576 = vmatmul.mubr.msk.f32.gmra.mxu0 %vm238_vm1, %v5233_v35 }
  0x30   : > { %4600 = vmatmul.mubr.msk.f32.gmra.mxu1 %vm238_vm1, %v5236_v36  ;;  %4654 = vmatprep.mubr.msk.f32.mxu0 %vm238_vm1, %v888_v38  ;;  %v5408_v38 = vld [vmem:[%s5070_s23 + $0xc2] sm:$0xff]  ;;  %v5548_v36 = vld [vmem:[%s5070_s23 + $0x16a] sm:$0xff] }
  0x31   : > { %4604 = vmatprep.mubr.msk.f32.mxu1 %vm238_vm1, %v171_v37  ;;  %v5405_v37 = vld [vmem:[%s5070_s23 + $0xc0] sm:$0xff]  ;;  %6623 = vst [vmem:[#allocation17_spill] sm:$0xff] %v5408_v38  ;;  %6637 = vst [vmem:[#allocation31_spill] sm:$0xff] %v5548_v36 }
  0x33   : > { %4655 = vmatmul.mubr.msk.f32.vlgmr.msra.gmra.mxu0 %vm238_vm1, %v889_v40  ;;  %v5422_v40 = vld [vmem:[%s5070_s23 + $0xca] sm:$0xff] }
  0x34   : > { %4605 = vmatmul.mubr.msk.f32.vlgmr.msra.gmra.mxu1 %vm238_vm1, %v172_v39  ;;  %4753 = vmatpush3.msk.msra.mxu0 %vm335_vm0, %v5100_v10  ;;  %v5402_v10 = vld [vmem:[%s5070_s23 + $0xb2] sm:$0xff]  ;;  %v5419_v39 = vld [vmem:[%s5070_s23 + $0xc8] sm:$0xff]  ;;  %6624 = vst [vmem:[#allocation18_spill] sm:$0xff] %v5422_v40 }
  0x35   : > { %4703 = vmatpush3.msk.msra.mxu1 %vm335_vm0, %v5095_v9  ;;  %4607 = vmatprep.mubr.msk.f32.mxu1 %vm238_vm1, %v5249_v41  ;;  %v5399_v9 = vld [vmem:[%s5070_s23 + $0xb0] sm:$0xff]  ;;  %6622 = vst [vmem:[#allocation16_spill] sm:$0xff] %v5402_v10 }
  0x36   : > { %4657 = vmatprep.mubr.msk.f32.mxu0 %vm238_vm1, %v5252_v42  ;;  %4802 = vmatprep.subr.msk.mxu1 %vm335_vm0, %v5259_v43  ;;  %v5545_v42 = vld [vmem:[%s5070_s23 + $0x168] sm:$0xff] }
  0x37   : > { %4852 = vmatprep.subr.msk.mxu0 %vm335_vm0, %v5264_v44  ;;  %4658 = vmatmul.mubr.msk.f32.gmra.mxu0 %vm238_vm1, %v5274_v46  ;;  %v5528_v46 = vld [vmem:[%s5070_s23 + $0x152] sm:$0xff] }
  0x38   : > { %4608 = vmatmul.mubr.msk.f32.gmra.mxu1 %vm238_vm1, %v5271_v45  ;;  %4660 = vmatprep.mubr.msk.f32.mxu0 %vm238_vm1, %v5284_v48  ;;  %v5525_v48 = vld [vmem:[%s5070_s23 + $0x150] sm:$0xff]  ;;  %6635 = vst [vmem:[#allocation29_spill] sm:$0xff] %v5528_v46 }
  0x39   : > { %4610 = vmatprep.mubr.msk.f32.mxu1 %vm238_vm1, %v5281_v47 }
  0x3b   : > { %4661 = vmatmul.mubr.msk.f32.gmra.mxu0 %vm238_vm1, %v5302_v50  ;;  %v5508_v50 = vld [vmem:[%s5070_s23 + $0x13a] sm:$0xff] }
  0x3c   : > { %4611 = vmatmul.mubr.msk.f32.gmra.mxu1 %vm238_vm1, %v5299_v49  ;;  %4663 = vmatprep.mubr.msk.f32.mxu0 %vm238_vm1, %v5308_v52  ;;  %v5505_v52 = vld [vmem:[%s5070_s23 + $0x138] sm:$0xff]  ;;  %6633 = vst [vmem:[#allocation27_spill] sm:$0xff] %v5508_v50 }
  0x3d   : > { %4613 = vmatprep.mubr.msk.f32.mxu1 %vm238_vm1, %v5305_v51 }
  0x3f   : > { %4664 = vmatmul.mubr.msk.f32.gmra.mxu0 %vm238_vm1, %v5322_v54  ;;  %v5488_v54 = vld [vmem:[%s5070_s23 + $0x122] sm:$0xff] }
  0x40   : > { %4614 = vmatmul.mubr.msk.f32.gmra.mxu1 %vm238_vm1, %v5319_v53  ;;  %4666 = vmatprep.mubr.msk.f32.mxu0 %vm238_vm1, %v5328_v56  ;;  %v5485_v56 = vld [vmem:[%s5070_s23 + $0x120] sm:$0xff]  ;;  %6631 = vst [vmem:[#allocation25_spill] sm:$0xff] %v5488_v54 }
  0x41   : > { %4616 = vmatprep.mubr.msk.f32.mxu1 %vm238_vm1, %v5325_v55 }
  0x43   : > { %4667 = vmatmul.mubr.msk.f32.gmra.mxu0 %vm238_vm1, %v5342_v58  ;;  %v5468_v58 = vld [vmem:[%s5070_s23 + $0x10a] sm:$0xff] }
  0x44   : > { %4617 = vmatmul.mubr.msk.f32.gmra.mxu1 %vm238_vm1, %v5339_v57  ;;  %4669 = vmatprep.mubr.msk.f32.mxu0 %vm238_vm1, %v5348_v60  ;;  %v5465_v60 = vld [vmem:[%s5070_s23 + $0x108] sm:$0xff]  ;;  %6629 = vst [vmem:[#allocation23_spill] sm:$0xff] %v5468_v58 }
  0x45   : > { %4619 = vmatprep.mubr.msk.f32.mxu1 %vm238_vm1, %v5345_v59 }
  0x47   : > { %4670 = vmatmul.mubr.msk.f32.gmra.mxu0 %vm238_vm1, %v5362_v62  ;;  %v5448_v62 = vld [vmem:[%s5070_s23 + $0xf2] sm:$0xff] }
  0x48   : > { %4620 = vmatmul.mubr.msk.f32.gmra.mxu1 %vm238_vm1, %v5359_v61  ;;  %4672 = vmatprep.mubr.msk.f32.mxu0 %vm238_vm1, %v5368_v0  ;;  %v5445_v0 = vld [vmem:[%s5070_s23 + $0xf0] sm:$0xff]  ;;  %6627 = vst [vmem:[#allocation21_spill] sm:$0xff] %v5448_v62 }
  0x49   : > { %4622 = vmatprep.mubr.msk.f32.mxu1 %vm238_vm1, %v5365_v63 }
  0x4b   : > { %4673 = vmatmul.mubr.msk.f32.gmra.mxu0 %vm238_vm1, %v5382_v2  ;;  %v5428_v2 = vld [vmem:[%s5070_s23 + $0xda] sm:$0xff] }
  0x4c   : > { %4623 = vmatmul.mubr.msk.f32.gmra.mxu1 %vm238_vm1, %v5379_v1  ;;  %4675 = vmatprep.mubr.msk.f32.mxu0 %vm238_vm1, %v5388_v5  ;;  %v5425_v5 = vld [vmem:[%s5070_s23 + $0xd8] sm:$0xff]  ;;  %6625 = vst [vmem:[#allocation19_spill] sm:$0xff] %v5428_v2 }
  0x4d   : > { %4625 = vmatprep.mubr.msk.f32.mxu1 %vm238_vm1, %v5385_v3 }
  0x4f   : > { %4676 = vmatmul.mubr.msk.f32.gmra.mxu0 %vm238_vm1, %v5402_v10  ;;  %v5442_v10 = vld [vmem:[%s5070_s23 + $0xe2] sm:$0xff] }
  0x50   : > { %4626 = vmatmul.mubr.msk.f32.gmra.mxu1 %vm238_vm1, %v5399_v9  ;;  %4678 = vmatprep.mubr.msk.f32.mxu0 %vm238_vm1, %v5408_v38  ;;  %v5439_v38 = vld [vmem:[%s5070_s23 + $0xe0] sm:$0xff]  ;;  %6626 = vst [vmem:[#allocation20_spill] sm:$0xff] %v5442_v10 }
  0x51   : > { %4628 = vmatprep.mubr.msk.f32.mxu1 %vm238_vm1, %v5405_v37 }
  0x53   : > { %4679 = vmatmul.mubr.msk.f32.gmra.mxu0 %vm238_vm1, %v5422_v40  ;;  %v5462_v40 = vld [vmem:[%s5070_s23 + $0xfa] sm:$0xff] }
  0x54   : > { %4629 = vmatmul.mubr.msk.f32.gmra.mxu1 %vm238_vm1, %v5419_v39  ;;  %4681 = vmatprep.mubr.msk.f32.mxu0 %vm238_vm1, %v5428_v2  ;;  %v5459_v2 = vld [vmem:[%s5070_s23 + $0xf8] sm:$0xff]  ;;  %6628 = vst [vmem:[#allocation22_spill] sm:$0xff] %v5462_v40 }
  0x55   : > { %4631 = vmatprep.mubr.msk.f32.mxu1 %vm238_vm1, %v5425_v5 }
  0x57   : > { %4682 = vmatmul.mubr.msk.f32.gmra.mxu0 %vm238_vm1, %v5442_v10  ;;  %v5482_v10 = vld [vmem:[%s5070_s23 + $0x112] sm:$0xff] }
  0x58   : > { %4632 = vmatmul.mubr.msk.f32.gmra.mxu1 %vm238_vm1, %v5439_v38  ;;  %4684 = vmatprep.mubr.msk.f32.mxu0 %vm238_vm1, %v5448_v62  ;;  %v5479_v62 = vld [vmem:[%s5070_s23 + $0x110] sm:$0xff]  ;;  %6630 = vst [vmem:[#allocation24_spill] sm:$0xff] %v5482_v10 }
  0x59   : > { %4634 = vmatprep.mubr.msk.f32.mxu1 %vm238_vm1, %v5445_v0 }
  0x5b   : > { %4685 = vmatmul.mubr.msk.f32.gmra.mxu0 %vm238_vm1, %v5462_v40  ;;  %v5502_v40 = vld [vmem:[%s5070_s23 + $0x12a] sm:$0xff] }
  0x5c   : > { %4635 = vmatmul.mubr.msk.f32.gmra.mxu1 %vm238_vm1, %v5459_v2  ;;  %4687 = vmatprep.mubr.msk.f32.mxu0 %vm238_vm1, %v5468_v58  ;;  %v5499_v58 = vld [vmem:[%s5070_s23 + $0x128] sm:$0xff]  ;;  %6632 = vst [vmem:[#allocation26_spill] sm:$0xff] %v5502_v40 }
  0x5d   : > { %4637 = vmatprep.mubr.msk.f32.mxu1 %vm238_vm1, %v5465_v60 }
  0x5f   : > { %4688 = vmatmul.mubr.msk.f32.gmra.mxu0 %vm238_vm1, %v5482_v10  ;;  %v5522_v10 = vld [vmem:[%s5070_s23 + $0x142] sm:$0xff] }
  0x60   : > { %4638 = vmatmul.mubr.msk.f32.gmra.mxu1 %vm238_vm1, %v5479_v62  ;;  %4690 = vmatprep.mubr.msk.f32.mxu0 %vm238_vm1, %v5488_v54  ;;  %v5519_v54 = vld [vmem:[%s5070_s23 + $0x140] sm:$0xff]  ;;  %6634 = vst [vmem:[#allocation28_spill] sm:$0xff] %v5522_v10 }
  0x61   : > { %4640 = vmatprep.mubr.msk.f32.mxu1 %vm238_vm1, %v5485_v56 }
  0x63   : > { %4691 = vmatmul.mubr.msk.f32.gmra.mxu0 %vm238_vm1, %v5502_v40  ;;  %v5542_v40 = vld [vmem:[%s5070_s23 + $0x15a] sm:$0xff] }
  0x64   : > { %4641 = vmatmul.mubr.msk.f32.gmra.mxu1 %vm238_vm1, %v5499_v58  ;;  %4693 = vmatprep.mubr.msk.f32.mxu0 %vm238_vm1, %v5508_v50  ;;  %v5539_v50 = vld [vmem:[%s5070_s23 + $0x158] sm:$0xff]  ;;  %6636 = vst [vmem:[#allocation30_spill] sm:$0xff] %v5542_v40 }
  0x65   : > { %4643 = vmatprep.mubr.msk.f32.mxu1 %vm238_vm1, %v5505_v52 }
  0x67   : > { %4694 = vmatmul.mubr.msk.f32.gmra.mxu0 %vm238_vm1, %v5522_v10  ;;  %v5562_v10 = vld [vmem:[%s5070_s23 + $0x172] sm:$0xff] }
  0x68   : > { %4644 = vmatmul.mubr.msk.f32.gmra.mxu1 %vm238_vm1, %v5519_v54  ;;  %4696 = vmatprep.mubr.msk.f32.mxu0 %vm238_vm1, %v5528_v46  ;;  %v5559_v46 = vld [vmem:[%s5070_s23 + $0x170] sm:$0xff]  ;;  %6638 = vst [vmem:[#allocation32_spill] sm:$0xff] %v5562_v10 }
  0x69   : > { %4646 = vmatprep.mubr.msk.f32.mxu1 %vm238_vm1, %v5525_v48 }
  0x6b   : > { %4697 = vmatmul.mubr.msk.f32.gmra.mxu0 %vm238_vm1, %v5542_v40 }
  0x6c   : > { %4647 = vmatmul.mubr.msk.f32.gmra.mxu1 %vm238_vm1, %v5539_v50  ;;  %4699 = vmatprep.mubr.msk.f32.mxu0 %vm238_vm1, %v5548_v36  ;;  %v5579_v36 = vld [vmem:[%s6545_s1 + $0x1c] sm:$0xf] }
  0x6d   : > { %4649 = vmatprep.mubr.msk.f32.mxu1 %vm238_vm1, %v5545_v42 }
  0x6f   : > { %4700 = vmatmul.mubr.msk.f32.gmra.mxu0 %vm238_vm1, %v5562_v10  ;;  %v5584_v10 = vld [vmem:[%s6545_s1 + $0x20] sm:$0xf] }
  0x70   : > { %4650 = vmatmul.mubr.msk.f32.gmra.mxu1 %vm238_vm1, %v5559_v46  ;;  %4754 = vmatprep.mubr.msk.f32.mxu0 %vm238_vm1, %v5084_v7  ;;  %v6640_v7 = vld [vmem:[#allocation2_spill] sm:$0xff] }
  0x71   : > { %4704 = vmatprep.mubr.msk.f32.mxu1 %vm238_vm1, %v5249_v41 }
  0x73   : > { %4755 = vmatmul.mubr.msk.f32.vlgmr.msra.gmra.mxu0 %vm238_vm1, %v5105_v11  ;;  %v5720_v11 = vld [vmem:[%s5070_s23 + $0x189] sm:$0xff] }
  0x74   : > { %4705 = vmatmul.mubr.msk.f32.vlgmr.msra.gmra.mxu1 %vm238_vm1, %v5271_v45  ;;  %4853 = vmatpush3.msk.msra.mxu0 %vm335_vm0, %v5264_v44  ;;  %6641 = vst [vmem:[#allocation2_spill] sm:$0xff] %v5720_v11  ;;  %v6659_v44 = vld [vmem:[#allocation20_spill] sm:$0xff]  ;;  %v6660_v45 = vld [vmem:[#allocation21_spill] sm:$0xff] }
  0x75   : > { %4803 = vmatpush3.msk.msra.mxu1 %vm335_vm0, %v5259_v43  ;;  %4707 = vmatprep.mubr.msk.f32.mxu1 %vm238_vm1, %v5281_v47 }
  0x76   : > { %4757 = vmatprep.mubr.msk.f32.mxu0 %vm238_vm1, %v5115_v13  ;;  %4902 = vmatprep.subr.msk.mxu1 %vm335_vm0, %v5579_v36 }
  0x77   : > { %4952 = vmatprep.subr.msk.mxu0 %vm335_vm0, %v5584_v10  ;;  %4758 = vmatmul.mubr.msk.f32.gmra.mxu0 %vm238_vm1, %v5133_v15 }
  0x78   : > { %4708 = vmatmul.mubr.msk.f32.gmra.mxu1 %vm238_vm1, %v5299_v49  ;;  %4760 = vmatprep.mubr.msk.f32.mxu0 %vm238_vm1, %v5139_v17 }
  0x79   : > { %4710 = vmatprep.mubr.msk.f32.mxu1 %vm238_vm1, %v5305_v51 }
  0x7b   : > { %4761 = vmatmul.mubr.msk.f32.gmra.mxu0 %vm238_vm1, %v5153_v19 }
  0x7c   : > { %4711 = vmatmul.mubr.msk.f32.gmra.mxu1 %vm238_vm1, %v5319_v53  ;;  %4763 = vmatprep.mubr.msk.f32.mxu0 %vm238_vm1, %v5159_v21 }
  0x7d   : > { %4713 = vmatprep.mubr.msk.f32.mxu1 %vm238_vm1, %v5325_v55 }
  0x7f   : > { %4764 = vmatmul.mubr.msk.f32.gmra.mxu0 %vm238_vm1, %v5173_v23 }
  0x80   : > { %4714 = vmatmul.mubr.msk.f32.gmra.mxu1 %vm238_vm1, %v5339_v57  ;;  %4766 = vmatprep.mubr.msk.f32.mxu0 %vm238_vm1, %v5179_v25 }
  0x81   : > { %4716 = vmatprep.mubr.msk.f32.mxu1 %vm238_vm1, %v5345_v59 }
  0x83   : > { %4767 = vmatmul.mubr.msk.f32.gmra.mxu0 %vm238_vm1, %v5193_v27 }
  0x84   : > { %4717 = vmatmul.mubr.msk.f32.gmra.mxu1 %vm238_vm1, %v5359_v61  ;;  %4769 = vmatprep.mubr.msk.f32.mxu0 %vm238_vm1, %v5199_v29  ;;  %v6651_v29 = vld [vmem:[#allocation12_spill] sm:$0xff] }
  0x85   : > { %4719 = vmatprep.mubr.msk.f32.mxu1 %vm238_vm1, %v5365_v63 }
  0x87   : > { %4770 = vmatmul.mubr.msk.f32.gmra.mxu0 %vm238_vm1, %v5213_v31  ;;  %v6653_v31 = vld [vmem:[#allocation14_spill] sm:$0xff] }
  0x88   : > { %4720 = vmatmul.mubr.msk.f32.gmra.mxu1 %vm238_vm1, %v5379_v1  ;;  %4772 = vmatprep.mubr.msk.f32.mxu0 %vm238_vm1, %v5219_v33  ;;  %v6655_v33 = vld [vmem:[#allocation16_spill] sm:$0xff] }
  0x89   : > { %4722 = vmatprep.mubr.msk.f32.mxu1 %vm238_vm1, %v5385_v3 }
  0x8b   : > { %4773 = vmatmul.mubr.msk.f32.gmra.mxu0 %vm238_vm1, %v5233_v35  ;;  %v6657_v35 = vld [vmem:[#allocation18_spill] sm:$0xff] }
  0x8c   : > { %4723 = vmatmul.mubr.msk.f32.gmra.mxu1 %vm238_vm1, %v5399_v9  ;;  %4775 = vmatprep.mubr.msk.f32.mxu0 %vm238_vm1, %v5074_v4  ;;  %v5703_v4 = vld [vmem:[%s5070_s23 + $0x180] sm:$0xff] }
  0x8d   : > { %4725 = vmatprep.mubr.msk.f32.mxu1 %vm238_vm1, %v5405_v37 }
  0x8f   : > { %4776 = vmatmul.mubr.msk.f32.gmra.mxu0 %vm238_vm1, %v5081_v6  ;;  %v5706_v6 = vld [vmem:[%s5070_s23 + $0x181] sm:$0xff] }
  0x90   : > { %4726 = vmatmul.mubr.msk.f32.gmra.mxu1 %vm238_vm1, %v5419_v39  ;;  %4778 = vmatprep.mubr.msk.f32.mxu0 %vm238_vm1, %v5087_v8  ;;  %6639 = vst [vmem:[#allocation33_spill] sm:$0xff] %v5706_v6  ;;  %v5717_v8 = vld [vmem:[%s5070_s23 + $0x188] sm:$0xff] }
  0x91   : > { %4728 = vmatprep.mubr.msk.f32.mxu1 %vm238_vm1, %v5425_v5 }
  0x93   : > { %4779 = vmatmul.mubr.msk.f32.gmra.mxu0 %vm238_vm1, %v5108_v12  ;;  %v6642_v12 = vld [vmem:[#allocation3_spill] sm:$0xff] }
  0x94   : > { %4729 = vmatmul.mubr.msk.f32.gmra.mxu1 %vm238_vm1, %v5439_v38  ;;  %4781 = vmatprep.mubr.msk.f32.mxu0 %vm238_vm1, %v5118_v14  ;;  %v6643_v14 = vld [vmem:[#allocation4_spill] sm:$0xff] }
  0x95   : > { %4731 = vmatprep.mubr.msk.f32.mxu1 %vm238_vm1, %v5445_v0 }
  0x97   : > { %4782 = vmatmul.mubr.msk.f32.gmra.mxu0 %vm238_vm1, %v5136_v16  ;;  %v6644_v16 = vld [vmem:[#allocation5_spill] sm:$0xff] }
  0x98   : > { %4732 = vmatmul.mubr.msk.f32.gmra.mxu1 %vm238_vm1, %v5459_v2  ;;  %4784 = vmatprep.mubr.msk.f32.mxu0 %vm238_vm1, %v5142_v18  ;;  %v6645_v18 = vld [vmem:[#allocation6_spill] sm:$0xff] }
  0x99   : > { %4734 = vmatprep.mubr.msk.f32.mxu1 %vm238_vm1, %v5465_v60 }
  0x9b   : > { %4785 = vmatmul.mubr.msk.f32.gmra.mxu0 %vm238_vm1, %v5156_v20  ;;  %v6646_v20 = vld [vmem:[#allocation7_spill] sm:$0xff] }
  0x9c   : > { %4735 = vmatmul.mubr.msk.f32.gmra.mxu1 %vm238_vm1, %v5479_v62  ;;  %4787 = vmatprep.mubr.msk.f32.mxu0 %vm238_vm1, %v5162_v22  ;;  %v6647_v22 = vld [vmem:[#allocation8_spill] sm:$0xff] }
  0x9d   : > { %4737 = vmatprep.mubr.msk.f32.mxu1 %vm238_vm1, %v5485_v56 }
  0x9f   : > { %4788 = vmatmul.mubr.msk.f32.gmra.mxu0 %vm238_vm1, %v5176_v24  ;;  %v6648_v24 = vld [vmem:[#allocation9_spill] sm:$0xff] }
  0xa0   : > { %4738 = vmatmul.mubr.msk.f32.gmra.mxu1 %vm238_vm1, %v5499_v58  ;;  %4790 = vmatprep.mubr.msk.f32.mxu0 %vm238_vm1, %v5182_v26  ;;  %v6649_v26 = vld [vmem:[#allocation10_spill] sm:$0xff] }
  0xa1   : > { %4740 = vmatprep.mubr.msk.f32.mxu1 %vm238_vm1, %v5505_v52 }
  0xa3   : > { %4791 = vmatmul.mubr.msk.f32.gmra.mxu0 %vm238_vm1, %v5196_v28  ;;  %v6650_v28 = vld [vmem:[#allocation11_spill] sm:$0xff] }
  0xa4   : > { %4741 = vmatmul.mubr.msk.f32.gmra.mxu1 %vm238_vm1, %v5519_v54  ;;  %4793 = vmatprep.mubr.msk.f32.mxu0 %vm238_vm1, %v5202_v30  ;;  %v6652_v30 = vld [vmem:[#allocation13_spill] sm:$0xff] }
  0xa5   : > { %4743 = vmatprep.mubr.msk.f32.mxu1 %vm238_vm1, %v5525_v48 }
  0xa7   : > { %4794 = vmatmul.mubr.msk.f32.gmra.mxu0 %vm238_vm1, %v5216_v32  ;;  %v6654_v32 = vld [vmem:[#allocation15_spill] sm:$0xff] }
  0xa8   : > { %4744 = vmatmul.mubr.msk.f32.gmra.mxu1 %vm238_vm1, %v5539_v50  ;;  %4796 = vmatprep.mubr.msk.f32.mxu0 %vm238_vm1, %v5222_v34  ;;  %v6656_v34 = vld [vmem:[#allocation17_spill] sm:$0xff] }
  0xa9   : > { %4746 = vmatprep.mubr.msk.f32.mxu1 %vm238_vm1, %v5545_v42 }
  0xab   : > { %4797 = vmatmul.mubr.msk.f32.gmra.mxu0 %vm238_vm1, %v6640_v7 }
  0xac   : > { %4747 = vmatmul.mubr.msk.f32.gmra.mxu1 %vm238_vm1, %v5559_v46  ;;  %4799 = vmatprep.mubr.msk.f32.mxu0 %vm238_vm1, %v5706_v6  ;;  %v4083_v6 = vld [vmem:[%s5070_s23 + $0x198] sm:$0xff] }
  0xad   : > { %4749 = vmatprep.mubr.msk.f32.mxu1 %vm238_vm1, %v5703_v4 }
  0xaf   : > { %4800 = vmatmul.mubr.msk.f32.gmra.mxu0 %vm238_vm1, %v5720_v11  ;;  %v5895_v11 = vld [vmem:[%s5070_s23 + $0x182] sm:$0xff] }
  0xb0   : > { %4750 = vmatmul.mubr.msk.f32.gmra.mxu1 %vm238_vm1, %v5717_v8  ;;  %4854 = vmatprep.mubr.msk.f32.mxu0 %vm238_vm1, %v5281_v47  ;;  %6674 = vst [vmem:[#allocation7_spill] sm:$0xff] %v5895_v11 }
  0xb1   : > { %4804 = vmatprep.mubr.msk.f32.mxu1 %vm238_vm1, %v6642_v12 }
  0xb3   : > { %4855 = vmatmul.mubr.msk.f32.vlgmr.msra.gmra.mxu0 %vm238_vm1, %v5299_v49 }
  0xb4   : > { %4805 = vmatmul.mubr.msk.f32.vlgmr.msra.gmra.mxu1 %vm238_vm1, %v6643_v14  ;;  %4953 = vmatpush3.msk.msra.mxu0 %vm335_vm0, %v5584_v10 }
  0xb5   : > { %4903 = vmatpush3.msk.msra.mxu1 %vm335_vm0, %v5579_v36  ;;  %4807 = vmatprep.mubr.msk.f32.mxu1 %vm238_vm1, %v6644_v16  ;;  %v6658_v36 = vld [vmem:[#allocation19_spill] sm:$0xff] }
  0xb6   : > { %4857 = vmatprep.mubr.msk.f32.mxu0 %vm238_vm1, %v5305_v51 }
  0xb7   : > { %4858 = vmatmul.mubr.msk.f32.gmra.mxu0 %vm238_vm1, %v5319_v53 }
  0xb8   : > { %4808 = vmatmul.mubr.msk.f32.gmra.mxu1 %vm238_vm1, %v6645_v18  ;;  %4860 = vmatprep.mubr.msk.f32.mxu0 %vm238_vm1, %v5325_v55  ;;  %v6661_v55 = vld [vmem:[#allocation22_spill] sm:$0xff] }
  0xb9   : > { %4810 = vmatprep.mubr.msk.f32.mxu1 %vm238_vm1, %v6646_v20 }
  0xbb   : > { %4861 = vmatmul.mubr.msk.f32.gmra.mxu0 %vm238_vm1, %v5339_v57  ;;  %v6662_v57 = vld [vmem:[#allocation23_spill] sm:$0xff] }
  0xbc   : > { %4811 = vmatmul.mubr.msk.f32.gmra.mxu1 %vm238_vm1, %v6647_v22  ;;  %4863 = vmatprep.mubr.msk.f32.mxu0 %vm238_vm1, %v5345_v59 }
  0xbd   : > { %4813 = vmatprep.mubr.msk.f32.mxu1 %vm238_vm1, %v6648_v24 }
  0xbf   : > { %4864 = vmatmul.mubr.msk.f32.gmra.mxu0 %vm238_vm1, %v5359_v61 }
  0xc0   : > { %4814 = vmatmul.mubr.msk.f32.gmra.mxu1 %vm238_vm1, %v6649_v26  ;;  %4866 = vmatprep.mubr.msk.f32.mxu0 %vm238_vm1, %v5365_v63 }
  0xc1   : > { %4816 = vmatprep.mubr.msk.f32.mxu1 %vm238_vm1, %v6650_v28 }
  0xc3   : > { %4867 = vmatmul.mubr.msk.f32.gmra.mxu0 %vm238_vm1, %v5379_v1 }
  0xc4   : > { %4817 = vmatmul.mubr.msk.f32.gmra.mxu1 %vm238_vm1, %v6651_v29  ;;  %4869 = vmatprep.mubr.msk.f32.mxu0 %vm238_vm1, %v5385_v3 }
  0xc5   : > { %4819 = vmatprep.mubr.msk.f32.mxu1 %vm238_vm1, %v6652_v30 }
  0xc7   : > { %4870 = vmatmul.mubr.msk.f32.gmra.mxu0 %vm238_vm1, %v5399_v9 }
  0xc8   : > { %4820 = vmatmul.mubr.msk.f32.gmra.mxu1 %vm238_vm1, %v6653_v31  ;;  %4872 = vmatprep.mubr.msk.f32.mxu0 %vm238_vm1, %v5405_v37 }
  0xc9   : > { %4822 = vmatprep.mubr.msk.f32.mxu1 %vm238_vm1, %v6654_v32 }
  0xcb   : > { %4873 = vmatmul.mubr.msk.f32.gmra.mxu0 %vm238_vm1, %v5419_v39 }
  0xcc   : > { %4823 = vmatmul.mubr.msk.f32.gmra.mxu1 %vm238_vm1, %v6655_v33  ;;  %4875 = vmatprep.mubr.msk.f32.mxu0 %vm238_vm1, %v5425_v5  ;;  %v6665_v5 = vld [vmem:[#allocation26_spill] sm:$0xff] }
  0xcd   : > { %4825 = vmatprep.mubr.msk.f32.mxu1 %vm238_vm1, %v6656_v34 }
  0xcf   : > { %4876 = vmatmul.mubr.msk.f32.gmra.mxu0 %vm238_vm1, %v5439_v38  ;;  %v6668_v38 = vld [vmem:[#allocation28_spill] sm:$0xff] }
  0xd0   : > { %4826 = vmatmul.mubr.msk.f32.gmra.mxu1 %vm238_vm1, %v6657_v35  ;;  %4878 = vmatprep.mubr.msk.f32.mxu0 %vm238_vm1, %v5445_v0  ;;  %v6663_v0 = vld [vmem:[#allocation24_spill] sm:$0xff] }
  0xd1   : > { %4828 = vmatprep.mubr.msk.f32.mxu1 %vm238_vm1, %v6658_v36 }
  0xd3   : > { %v5798_v41 = vpop.f32.mrf.mxu0  ;;  %4879 = vmatmul.mubr.msk.f32.gmra.mxu0 %vm238_vm1, %v5459_v2 }
  0xd4   : > { %v5800_v43 = vpop.f32.mrf.mxu1  ;;  %4829 = vmatmul.mubr.msk.f32.gmra.mxu1 %vm238_vm1, %v6659_v44  ;;  %4881 = vmatprep.mubr.msk.f32.mxu0 %vm238_vm1, %v5465_v60 }
  0xd5   : > { %4831 = vmatprep.mubr.msk.f32.mxu1 %vm238_vm1, %v6660_v45  ;;  %v5810_v47 = vpop.f32.mrf.mxu0 }
  0xd6   : > { %v5812_v49 = vpop.f32.mrf.mxu1 }
  0xd7   : > { %v5814_v51 = vpop.f32.mrf.mxu0  ;;  %4882 = vmatmul.mubr.msk.f32.gmra.mxu0 %vm238_vm1, %v5479_v62  ;;  %v6664_v62 = vld [vmem:[#allocation25_spill] sm:$0xff] }
  0xd8   : > { %v5816_v53 = vpop.f32.mrf.mxu1  ;;  %4832 = vmatmul.mubr.msk.f32.gmra.mxu1 %vm238_vm1, %v6661_v55  ;;  %4884 = vmatprep.mubr.msk.f32.mxu0 %vm238_vm1, %v5485_v56 }
  0xd9   : > { %4834 = vmatprep.mubr.msk.f32.mxu1 %vm238_vm1, %v6662_v57  ;;  %v5826_v59 = vpop.f32.mrf.mxu0 }
  0xda   : > { %v5828_v60 = vpop.f32.mrf.mxu1 }
  0xdb   : > { %v5830_v61 = vpop.f32.mrf.mxu0  ;;  %4885 = vmatmul.mubr.msk.f32.gmra.mxu0 %vm238_vm1, %v5499_v58  ;;  %v6666_v58 = vld [vmem:[#allocation27_spill] sm:$0xff] }
  0xdc   : > { %v5832_v63 = vpop.f32.mrf.mxu1  ;;  %4835 = vmatmul.mubr.msk.f32.gmra.mxu1 %vm238_vm1, %v6663_v0  ;;  %4887 = vmatprep.mubr.msk.f32.mxu0 %vm238_vm1, %v5505_v52 }
  0xdd   : > { %4837 = vmatprep.mubr.msk.f32.mxu1 %vm238_vm1, %v6664_v62  ;;  %v5842_v56 = vpop.f32.mrf.mxu0 }
  0xde   : > { %v5844_v1 = vpop.f32.mrf.mxu1 }
  0xdf   : > { %v5846_v2 = vpop.f32.mrf.mxu0  ;;  %4888 = vmatmul.mubr.msk.f32.gmra.mxu0 %vm238_vm1, %v5519_v54  ;;  %v6669_v54 = vld [vmem:[#allocation29_spill] sm:$0xff] }
  0xe0   : > { %v5848_v3 = vpop.f32.mrf.mxu1  ;;  %4838 = vmatmul.mubr.msk.f32.gmra.mxu1 %vm238_vm1, %v6665_v5  ;;  %4890 = vmatprep.mubr.msk.f32.mxu0 %vm238_vm1, %v5525_v48 }
  0xe1   : > { %4840 = vmatprep.mubr.msk.f32.mxu1 %vm238_vm1, %v6666_v58  ;;  %v5858_v52 = vpop.f32.mrf.mxu0 }
  0xe2   : > { %v5860_v9 = vpop.f32.mrf.mxu1 }
  0xe3   : > { %v5862_v10 = vpop.f32.mrf.mxu0  ;;  %4891 = vmatmul.mubr.msk.f32.gmra.mxu0 %vm238_vm1, %v5539_v50  ;;  %v6672_v50 = vld [vmem:[#allocation31_spill] sm:$0xff] }
  0xe4   : > { %v5864_v37 = vpop.f32.mrf.mxu1  ;;  %4841 = vmatmul.mubr.msk.f32.gmra.mxu1 %vm238_vm1, %v6668_v38  ;;  %4893 = vmatprep.mubr.msk.f32.mxu0 %vm238_vm1, %v5545_v42 }
  0xe5   : > { %6667 = vst [vmem:[#allocation3_spill] sm:$0xff] %v5864_v37  ;;  %4843 = vmatprep.mubr.msk.f32.mxu1 %vm238_vm1, %v6669_v54  ;;  %v5874_v48 = vpop.f32.mrf.mxu0  ;;  %v6676_v37 = vld [vmem:[#allocation32_spill] sm:$0xff] }
  0xe6   : > { %v5876_v39 = vpop.f32.mrf.mxu1 }
  0xe7   : > { %6670 = vst [vmem:[#allocation4_spill] sm:$0xff] %v5876_v39  ;;  %v5878_v7 = vpop.f32.mrf.mxu0  ;;  %4894 = vmatmul.mubr.msk.f32.gmra.mxu0 %vm238_vm1, %v5559_v46  ;;  %v5910_v46 = vld [vmem:[%s5070_s23 + $0x18a] sm:$0xff] }
  0xe8   : > { %v5880_v12 = vpop.f32.mrf.mxu1  ;;  %4844 = vmatmul.mubr.msk.f32.gmra.mxu1 %vm238_vm1, %v5542_v40  ;;  %4896 = vmatprep.mubr.msk.f32.mxu0 %vm238_vm1, %v5703_v4  ;;  %6677 = vst [vmem:[#allocation9_spill] sm:$0xff] %v5910_v46  ;;  %v4084_v4 = vld [vmem:[%s5070_s23 + $0x1a0] sm:$0xff] }
  0xe9   : > { %6671 = vst [vmem:[#allocation5_spill] sm:$0xff] %v5880_v12  ;;  %4846 = vmatprep.mubr.msk.f32.mxu1 %vm238_vm1, %v6672_v50  ;;  %v5890_v42 = vpop.f32.mrf.mxu0 }
  0xea   : > { %v5892_v14 = vpop.f32.mrf.mxu1 }
  0xeb   : > { %6673 = vst [vmem:[#allocation6_spill] sm:$0xff] %v5892_v14  ;;  %v5898_v12 = vpop.f32.mrf.mxu0  ;;  %4897 = vmatmul.mubr.msk.f32.gmra.mxu0 %vm238_vm1, %v5717_v8 }
  0xec   : > { %v5900_v39 = vpop.f32.mrf.mxu1  ;;  %4847 = vmatmul.mubr.msk.f32.gmra.mxu1 %vm238_vm1, %v6676_v37  ;;  %4899 = vmatprep.mubr.msk.f32.mxu0 %vm238_vm1, %v4083_v6 }
  0xed   : > { %6675 = vst [vmem:[#allocation8_spill] sm:$0xff] %v5900_v39  ;;  %4849 = vmatprep.mubr.msk.f32.mxu1 %vm238_vm1, %v5895_v11  ;;  %v5913_v50 = vpop.f32.mrf.mxu0 }
  0xee   : > { %v5915_v14 = vpop.f32.mrf.mxu1 }
  0xef   : > { %6678 = vst [vmem:[#allocation10_spill] sm:$0xff] %v5915_v14  ;;  %v5917_v40 = vpop.f32.mrf.mxu0  ;;  %4900 = vmatmul.mubr.msk.f32.gmra.mxu0 %vm238_vm1, %v4084_v4 }
  0xf0   : > { %v5919_v39 = vpop.f32.mrf.mxu1  ;;  %4850 = vmatmul.mubr.msk.f32.gmra.mxu1 %vm238_vm1, %v5910_v46  ;;  %4954 = vmatprep.mubr.msk.f32.mxu0 %vm238_vm1, %v6644_v16 }
  0xf1   : > { %6679 = vst [vmem:[#allocation11_spill] sm:$0xff] %v5919_v39  ;;  %4904 = vmatprep.mubr.msk.f32.mxu1 %vm238_vm1, %v5115_v13  ;;  %v5928_v6 = vpop.f32.mrf.mxu0 }
  0xf2   : > { %v5930_v8 = vpop.f32.mrf.mxu1 }
  0xf3   : > { %6680 = vst [vmem:[#allocation12_spill] sm:$0xff] %v5930_v8  ;;  %v4656_v14 = vpop.f32.mrf.mxu0  ;;  %4955 = vmatmul.mubr.msk.f32.vlgmr.msra.gmra.mxu0 %vm238_vm1, %v6645_v18 }
  0xf4   : > { %v4606_v37 = vpop.f32.mrf.mxu1  ;;  %4905 = vmatmul.mubr.msk.f32.vlgmr.msra.gmra.mxu1 %vm238_vm1, %v5133_v15  ;;  %4957 = vmatprep.mubr.msk.f32.mxu0 %vm238_vm1, %v6646_v20 }
  0xf5   : > { %v735_v4 = vadd.f32 %v4606_v37, %v5798_v41  ;;  %4907 = vmatprep.mubr.msk.f32.mxu1 %vm238_vm1, %v5139_v17  ;;  %v1087_v16 = vpop.f32.mrf.mxu0  ;;  %v4129_v37 = vld [vmem:[%s5070_s23 + $0xa9] sm:$0xff] }
  0xf6   : > { %v729_v13 = vpop.f32.mrf.mxu1 }
  0xf7   : > { %v5941_v39 = vadd.f32 %v4656_v14, %v735_v4  ;;  %v730_v8 = vadd.f32 %v729_v13, %v5810_v47  ;;  %v4659_v11 = vpop.f32.mrf.mxu0  ;;  %4958 = vmatmul.mubr.msk.f32.gmra.mxu0 %vm238_vm1, %v6647_v22 }
  0xf8   : > { %v4609_v46 = vpop.f32.mrf.mxu1  ;;  %4908 = vmatmul.mubr.msk.f32.gmra.mxu1 %vm238_vm1, %v5153_v19  ;;  %4960 = vmatprep.mubr.msk.f32.mxu0 %vm238_vm1, %v6648_v24 }
  0xf9   : > { %v5948_v15 = vadd.f32 %v1087_v16, %v730_v8  ;;  %v745_v17 = vadd.f32 %v4609_v46, %v5814_v51  ;;  %4910 = vmatprep.mubr.msk.f32.mxu1 %vm238_vm1, %v5159_v21  ;;  %v1097_v20 = vpop.f32.mrf.mxu0  ;;  %v4127_v51 = vld [vmem:[%s5070_s23 + $0x91] sm:$0xff] }
  0xfa   : > { %v739_v18 = vpop.f32.mrf.mxu1  ;;  %v4130_v16 = vld [vmem:[%s5070_s23 + $0xb1] sm:$0xff] }
  0xfb   : > { %v5955_v41 = vadd.f32 %v4659_v11, %v745_v17  ;;  %v740_v19 = vadd.f32 %v739_v18, %v5826_v59  ;;  %v4662_v14 = vpop.f32.mrf.mxu0  ;;  %4961 = vmatmul.mubr.msk.f32.gmra.mxu0 %vm238_vm1, %v6649_v26  ;;  %v4131_v18 = vld [vmem:[%s5070_s23 + $0xc1] sm:$0xff] }
  0xfc   : > { %v4612_v47 = vpop.f32.mrf.mxu1  ;;  %4911 = vmatmul.mubr.msk.f32.gmra.mxu1 %vm238_vm1, %v5173_v23  ;;  %4963 = vmatprep.mubr.msk.f32.mxu0 %vm238_vm1, %v6650_v28 }
  0xfd   : > { %v5962_v22 = vadd.f32 %v1097_v20, %v740_v19  ;;  %v755_v21 = vadd.f32 %v4612_v47, %v5830_v61  ;;  %4913 = vmatprep.mubr.msk.f32.mxu1 %vm238_vm1, %v5179_v25  ;;  %v1107_v24 = vpop.f32.mrf.mxu0  ;;  %v4128_v61 = vld [vmem:[%s5070_s23 + $0x99] sm:$0xff] }
  0xfe   : > { %v749_v11 = vpop.f32.mrf.mxu1 }
  0xff   : > { %v5970_v59 = vadd.f32 %v4662_v14, %v755_v21  ;;  %v750_v23 = vadd.f32 %v749_v11, %v5842_v56  ;;  %v4665_v46 = vpop.f32.mrf.mxu0  ;;  %4964 = vmatmul.mubr.msk.f32.gmra.mxu0 %vm238_vm1, %v6651_v29  ;;  %v4132_v14 = vld [vmem:[%s5070_s23 + $0xc9] sm:$0xff]  ;;  %v4133_v11 = vld [vmem:[%s5070_s23 + $0xd9] sm:$0xff] }
 0x100   : > { %v4615_v26 = vpop.f32.mrf.mxu1  ;;  %4914 = vmatmul.mubr.msk.f32.gmra.mxu1 %vm238_vm1, %v5193_v27  ;;  %4966 = vmatprep.mubr.msk.f32.mxu0 %vm238_vm1, %v6652_v30 }
 0x101   : > { %v5977_v25 = vadd.f32 %v1107_v24, %v750_v23  ;;  %v765_v28 = vadd.f32 %v4615_v26, %v5846_v2  ;;  %4916 = vmatprep.mubr.msk.f32.mxu1 %vm238_vm1, %v4127_v51  ;;  %v1117_v8 = vpop.f32.mrf.mxu0  ;;  %v4134_v26 = vld [vmem:[%s5070_s23 + $0xe1] sm:$0xff] }
 0x102   : > { %v759_v56 = vpop.f32.mrf.mxu1 }
 0x103   : > { %v5985_v4 = vadd.f32 %v4665_v46, %v765_v28  ;;  %v760_v27 = vadd.f32 %v759_v56, %v5858_v52  ;;  %v4668_v13 = vpop.f32.mrf.mxu0  ;;  %4967 = vmatmul.mubr.msk.f32.gmra.mxu0 %vm238_vm1, %v6653_v31  ;;  %v4135_v28 = vld [vmem:[%s5070_s23 + $0xf1] sm:$0xff] }
 0x104   : > { %v4618_v29 = vpop.f32.mrf.mxu1  ;;  %4917 = vmatmul.mubr.msk.f32.gmra.mxu1 %vm238_vm1, %v4128_v61  ;;  %4969 = vmatprep.mubr.msk.f32.mxu0 %vm238_vm1, %v6654_v32 }
 0x105   : > { %v5991_v2 = vadd.f32 %v1117_v8, %v760_v27  ;;  %v775_v30 = vadd.f32 %v4618_v29, %v5862_v10  ;;  %4919 = vmatprep.mubr.msk.f32.mxu1 %vm238_vm1, %v4129_v37  ;;  %v1127_v52 = vpop.f32.mrf.mxu0  ;;  %v4136_v37 = vld [vmem:[%s5070_s23 + $0xf9] sm:$0xff]  ;;  %v4137_v29 = vld [vmem:[%s5070_s23 + $0x109] sm:$0xff] }
 0x106   : > { %v769_v17 = vpop.f32.mrf.mxu1 }
 0x107   : > { %v5999_v20 = vadd.f32 %v4668_v13, %v775_v30  ;;  %v770_v19 = vadd.f32 %v769_v17, %v5874_v48  ;;  %v4671_v47 = vpop.f32.mrf.mxu0  ;;  %4970 = vmatmul.mubr.msk.f32.gmra.mxu0 %vm238_vm1, %v6655_v33  ;;  %v4138_v17 = vld [vmem:[%s5070_s23 + $0x111] sm:$0xff] }
 0x108   : > { %v4621_v31 = vpop.f32.mrf.mxu1  ;;  %4920 = vmatmul.mubr.msk.f32.gmra.mxu1 %vm238_vm1, %v4130_v16  ;;  %4972 = vmatprep.mubr.msk.f32.mxu0 %vm238_vm1, %v6656_v34 }
 0x109   : > { %v6005_v10 = vadd.f32 %v1127_v52, %v770_v19  ;;  %v785_v32 = vadd.f32 %v4621_v31, %v5878_v7  ;;  %4922 = vmatprep.mubr.msk.f32.mxu1 %vm238_vm1, %v4131_v18  ;;  %v1137_v48 = vpop.f32.mrf.mxu0  ;;  %v4139_v18 = vld [vmem:[%s5070_s23 + $0x121] sm:$0xff] }
 0x10a   : > { %v779_v21 = vpop.f32.mrf.mxu1 }
 0x10b   : > { %v6013_v24 = vadd.f32 %v4671_v47, %v785_v32  ;;  %v780_v51 = vadd.f32 %v779_v21, %v5890_v42  ;;  %v4674_v23 = vpop.f32.mrf.mxu0  ;;  %4973 = vmatmul.mubr.msk.f32.gmra.mxu0 %vm238_vm1, %v6657_v35  ;;  %v4140_v32 = vld [vmem:[%s5070_s23 + $0x129] sm:$0xff]  ;;  %v4141_v21 = vld [vmem:[%s5070_s23 + $0x139] sm:$0xff] }
 0x10c   : > { %v4624_v33 = vpop.f32.mrf.mxu1  ;;  %4923 = vmatmul.mubr.msk.f32.gmra.mxu1 %vm238_vm1, %v4132_v14  ;;  %4975 = vmatprep.mubr.msk.f32.mxu0 %vm238_vm1, %v6658_v36 }
 0x10d   : > { %v6019_v7 = vadd.f32 %v1137_v48, %v780_v51  ;;  %v795_v34 = vadd.f32 %v4624_v33, %v5898_v12  ;;  %4925 = vmatprep.mubr.msk.f32.mxu1 %vm238_vm1, %v4133_v11  ;;  %v1147_v42 = vpop.f32.mrf.mxu0  ;;  %v4142_v33 = vld [vmem:[%s5070_s23 + $0x141] sm:$0xff] }
 0x10e   : > { %v789_v46 = vpop.f32.mrf.mxu1 }
 0x10f   : > { %v6027_v61 = vadd.f32 %v4674_v23, %v795_v34  ;;  %v790_v56 = vadd.f32 %v789_v46, %v5913_v50  ;;  %v4677_v8 = vpop.f32.mrf.mxu0  ;;  %4976 = vmatmul.mubr.msk.f32.gmra.mxu0 %vm238_vm1, %v6659_v44  ;;  %v4143_v34 = vld [vmem:[%s5070_s23 + $0x151] sm:$0xff] }
 0x110   : > { %v4627_v35 = vpop.f32.mrf.mxu1  ;;  %4926 = vmatmul.mubr.msk.f32.gmra.mxu1 %vm238_vm1, %v4134_v26  ;;  %4978 = vmatprep.mubr.msk.f32.mxu0 %vm238_vm1, %v6660_v45 }
 0x111   : > { %v6033_v12 = vadd.f32 %v1147_v42, %v790_v56  ;;  %v805_v36 = vadd.f32 %v4627_v35, %v5917_v40  ;;  %4928 = vmatprep.mubr.msk.f32.mxu1 %vm238_vm1, %v4135_v28  ;;  %v1157_v50 = vpop.f32.mrf.mxu0  ;;  %v4144_v28 = vld [vmem:[%s5070_s23 + $0x159] sm:$0xff]  ;;  %v4145_v35 = vld [vmem:[%s5070_s23 + $0x169] sm:$0xff] }
 0x112   : > { %v799_v27 = vpop.f32.mrf.mxu1 }
 0x113   : > { %v6041_v13 = vadd.f32 %v4677_v8, %v805_v36  ;;  %v800_v30 = vadd.f32 %v799_v27, %v5928_v6  ;;  %v4680_v16 = vpop.f32.mrf.mxu0  ;;  %4979 = vmatmul.mubr.msk.f32.gmra.mxu0 %vm238_vm1, %v6661_v55  ;;  %v4211_v8 = vld [vmem:[%s5070_s23 + $0x16a] sm:$0xff] }
 0x114   : > { %v4630_v44 = vpop.f32.mrf.mxu1  ;;  %4929 = vmatmul.mubr.msk.f32.gmra.mxu1 %vm238_vm1, %v4136_v37  ;;  %4981 = vmatprep.mubr.msk.f32.mxu0 %vm238_vm1, %v6662_v57 }
 0x115   : > { %v6047_v40 = vadd.f32 %v1157_v50, %v800_v30  ;;  %v815_v45 = vadd.f32 %v4630_v44, %v5800_v43  ;;  %4931 = vmatprep.mubr.msk.f32.mxu1 %vm238_vm1, %v4137_v29  ;;  %v1167_v6 = vpop.f32.mrf.mxu0  ;;  %v4146_v30 = vld [vmem:[%s5070_s23 + $0x171] sm:$0xff] }
 0x116   : > { %v809_v52 = vpop.f32.mrf.mxu1  ;;  %v4212_v44 = vld [vmem:[%s5070_s23 + $0x172] sm:$0xff] }
 0x117   : > { %v6055_v19 = vadd.f32 %v4680_v16, %v815_v45  ;;  %v810_v31 = vadd.f32 %v809_v52, %v5812_v49  ;;  %v4683_v47 = vpop.f32.mrf.mxu0  ;;  %4982 = vmatmul.mubr.msk.f32.gmra.mxu0 %vm238_vm1, %v6663_v0 }
 0x118   : > { %v4633_v55 = vpop.f32.mrf.mxu1  ;;  %4932 = vmatmul.mubr.msk.f32.gmra.mxu1 %vm238_vm1, %v4138_v17  ;;  %4984 = vmatprep.mubr.msk.f32.mxu0 %vm238_vm1, %v6664_v62  ;;  %v6683_v17 = vld [vmem:[#allocation4_spill] sm:$0xff] }
 0x119   : > { %v6061_v43 = vadd.f32 %v1167_v6, %v810_v31  ;;  %v825_v57 = vadd.f32 %v4633_v55, %v5816_v53  ;;  %4934 = vmatprep.mubr.msk.f32.mxu1 %vm238_vm1, %v4139_v18  ;;  %v1177_v49 = vpop.f32.mrf.mxu0  ;;  %v6684_v55 = vld [vmem:[#allocation5_spill] sm:$0xff] }
 0x11a   : > { %v819_v14 = vpop.f32.mrf.mxu1 }
 0x11b   : > { %v6069_v48 = vadd.f32 %v4683_v47, %v825_v57  ;;  %v820_v11 = vadd.f32 %v819_v14, %v5828_v60  ;;  %v4686_v51 = vpop.f32.mrf.mxu0  ;;  %4985 = vmatmul.mubr.msk.f32.gmra.mxu0 %vm238_vm1, %v6665_v5  ;;  %v6685_v57 = vld [vmem:[#allocation33_spill] sm:$0xff] }
 0x11c   : > { %v4636_v0 = vpop.f32.mrf.mxu1  ;;  %4935 = vmatmul.mubr.msk.f32.gmra.mxu1 %vm238_vm1, %v4140_v32  ;;  %4987 = vmatprep.mubr.msk.f32.mxu0 %vm238_vm1, %v6666_v58  ;;  %v6686_v32 = vld [vmem:[#allocation7_spill] sm:$0xff] }
 0x11d   : > { %v6075_v53 = vadd.f32 %v1177_v49, %v820_v11  ;;  %v835_v62 = vadd.f32 %v4636_v0, %v5832_v63  ;;  %4937 = vmatprep.mubr.msk.f32.mxu1 %vm238_vm1, %v4141_v21  ;;  %v1187_v60 = vpop.f32.mrf.mxu0  ;;  %v4149_v21 = vld [vmem:[%s5070_s23 + $0x199] sm:$0xff] }
 0x11e   : > { %v829_v23 = vpop.f32.mrf.mxu1  ;;  %v4215_v11 = vld [vmem:[%s5070_s23 + $0x19a] sm:$0xff] }
 0x11f   : > { %v6083_v26 = vadd.f32 %v4686_v51, %v835_v62  ;;  %v830_v5 = vadd.f32 %v829_v23, %v5844_v1  ;;  %v4689_v42 = vpop.f32.mrf.mxu0  ;;  %4988 = vmatmul.mubr.msk.f32.gmra.mxu0 %vm238_vm1, %v6668_v38  ;;  %v6687_v51 = vld [vmem:[#allocation6_spill] sm:$0xff] }
 0x120   : > { %v4639_v46 = vpop.f32.mrf.mxu1  ;;  %4938 = vmatmul.mubr.msk.f32.gmra.mxu1 %vm238_vm1, %v4142_v33  ;;  %4990 = vmatprep.mubr.msk.f32.mxu0 %vm238_vm1, %v6669_v54  ;;  %v6682_v54 = vld [vmem:[#allocation3_spill] sm:$0xff] }
 0x121   : > { %v6089_v63 = vadd.f32 %v1187_v60, %v830_v5  ;;  %v845_v58 = vadd.f32 %v4639_v46, %v5848_v3  ;;  %4940 = vmatprep.mubr.msk.f32.mxu1 %vm238_vm1, %v4143_v34  ;;  %v1197_v56 = vpop.f32.mrf.mxu0  ;;  %v6681_v3 = vld [vmem:[#allocation30_spill] sm:$0xff]  ;;  %v6689_v34 = vld [vmem:[#allocation9_spill] sm:$0xff]  ;;  %v6690_v46 = vld [vmem:[#allocation8_spill] sm:$0xff] }
 0x122   : > { %v839_v1 = vpop.f32.mrf.mxu1  ;;  %v6688_v60 = vld [vmem:[#allocation2_spill] sm:$0xff] }
 0x123   : > { %v6098_v36 = vadd.f32 %v4689_v42, %v845_v58  ;;  %v840_v38 = vadd.f32 %v839_v1, %v5860_v9  ;;  %v4692_v27 = vpop.f32.mrf.mxu0  ;;  %4991 = vmatmul.mubr.msk.f32.gmra.mxu0 %vm238_vm1, %v6681_v3  ;;  %v4150_v58 = vld [vmem:[%s5070_s23 + $0x1a1] sm:$0xff] }
 0x124   : > { %v4642_v37 = vpop.f32.mrf.mxu1  ;;  %4941 = vmatmul.mubr.msk.f32.gmra.mxu1 %vm238_vm1, %v4144_v28  ;;  %4993 = vmatprep.mubr.msk.f32.mxu0 %vm238_vm1, %v4211_v8  ;;  %v4216_v28 = vld [vmem:[%s5070_s23 + $0x1a2] sm:$0xff] }
 0x125   : > { %v6104_v50 = vadd.f32 %v1197_v56, %v840_v38  ;;  %v855_v29 = vadd.f32 %v4642_v37, %v6682_v54  ;;  %4943 = vmatprep.mubr.msk.f32.mxu1 %vm238_vm1, %v4145_v35  ;;  %v1207_v16 = vpop.f32.mrf.mxu0  ;;  %v6691_v8 = vld [vmem:[#allocation10_spill] sm:$0xff]  ;;  %v6692_v54 = vld [vmem:[#allocation11_spill] sm:$0xff] }
 0x126   : > { %v849_v9 = vpop.f32.mrf.mxu1 }
 0x127   : > { %v6111_v45 = vadd.f32 %v4692_v27, %v855_v29  ;;  %v850_v52 = vadd.f32 %v849_v9, %v6683_v17  ;;  %v4695_v18 = vpop.f32.mrf.mxu0  ;;  %4994 = vmatmul.mubr.msk.f32.gmra.mxu0 %vm238_vm1, %v4212_v44 }
 0x128   : > { %v4645_v6 = vpop.f32.mrf.mxu1  ;;  %4944 = vmatmul.mubr.msk.f32.gmra.mxu1 %vm238_vm1, %v4146_v30  ;;  %4996 = vmatprep.mubr.msk.f32.mxu0 %vm238_vm1, %v6686_v32 }
 0x129   : > { %v6116_v31 = vadd.f32 %v1207_v16, %v850_v52  ;;  %v865_v47 = vadd.f32 %v4645_v6, %v6684_v55  ;;  %4946 = vmatprep.mubr.msk.f32.mxu1 %vm238_vm1, %v6685_v57  ;;  %v1217_v49 = vpop.f32.mrf.mxu0  ;;  %v6693_v16 = vld [vmem:[#allocation12_spill] sm:$0xff] }
 0x12a   : > { %v859_v14 = vpop.f32.mrf.mxu1 }
 0x12b   : > { %v6125_v0 = vadd.f32 %v4695_v18, %v865_v47  ;;  %v860_v62 = vadd.f32 %v859_v14, %v6687_v51  ;;  %v4698_v23 = vpop.f32.mrf.mxu0  ;;  %4997 = vmatmul.mubr.msk.f32.gmra.mxu0 %vm238_vm1, %v6689_v34 }
 0x12c   : > { %v4648_v33 = vpop.f32.mrf.mxu1  ;;  %4947 = vmatmul.mubr.msk.f32.gmra.mxu1 %vm238_vm1, %v6688_v60  ;;  %4999 = vmatprep.mubr.msk.f32.mxu0 %vm238_vm1, %v4215_v11 }
 0x12d   : > { %v6132_v5 = vadd.f32 %v1217_v49, %v860_v62  ;;  %v875_v42 = vadd.f32 %v4648_v33, %v6690_v46  ;;  %4949 = vmatprep.mubr.msk.f32.mxu1 %vm238_vm1, %v4149_v21  ;;  %v1227_v56 = vpop.f32.mrf.mxu0 }
 0x12e   : > { %v869_v1 = vpop.f32.mrf.mxu1 }
 0x12f   : > { %v6139_v35 = vadd.f32 %v4698_v23, %v875_v42  ;;  %v870_v38 = vadd.f32 %v869_v1, %v6691_v8  ;;  %v4701_v27 = vpop.f32.mrf.mxu0  ;;  %5000 = vmatmul.mubr.msk.f32.gmra.mxu0 %vm238_vm1, %v4216_v28 }
 0x130   : > { %v4651_v37 = vpop.f32.mrf.mxu1  ;;  %4950 = vmatmul.mubr.msk.f32.gmra.mxu1 %vm238_vm1, %v4150_v58 }
 0x131   : > { %v6144_v3 = vadd.f32 %v1227_v56, %v870_v38  ;;  %v885_v29 = vadd.f32 %v4651_v37, %v6692_v54  ;;  %v1237_v44 = vpop.f32.mrf.mxu0 }
 0x132   : > { %v879_v30 = vpop.f32.mrf.mxu1 }
 0x133   : > { %v6147_v9 = vadd.f32 %v4701_v27, %v885_v29  ;;  %v880_v17 = vadd.f32 %v879_v30, %v6693_v16  ;;  %v4756_v6 = vpop.f32.mrf.mxu0 }
 0x134   : > { %v4706_v52 = vpop.f32.mrf.mxu1 }
 0x135   : > { %v6150_v18 = vadd.f32 %v1237_v44, %v880_v17  ;;  %v1638_v55 = vadd.f32 %v4706_v52, %v5941_v39  ;;  %v1868_v57 = vpop.f32.mrf.mxu0 }
 0x136   : > { %v1478_v47 = vpop.f32.mrf.mxu1 }
 0x137   : > { %v6153_v32 = vadd.f32 %v4756_v6, %v1638_v55  ;;  %v1637_v14 = vadd.f32 %v1478_v47, %v5948_v15  ;;  %v4759_v21 = vpop.f32.mrf.mxu0 }
 0x138   : > { %v4709_v49 = vpop.f32.mrf.mxu1 }
 0x139   : > { %v6156_v11 = vadd.f32 %v1868_v57, %v1637_v14  ;;  %v1640_v51 = vadd.f32 %v4709_v49, %v5955_v41  ;;  %v1878_v33 = vpop.f32.mrf.mxu0 }
 0x13a   : > { %v1488_v62 = vpop.f32.mrf.mxu1 }
 0x13b   : > { %v6159_v23 = vadd.f32 %v4759_v21, %v1640_v51  ;;  %v1639_v60 = vadd.f32 %v1488_v62, %v5962_v22  ;;  %v4762_v39 = vpop.f32.mrf.mxu0 }
 0x13c   : > { %v4712_v34 = vpop.f32.mrf.mxu1 }
 0x13d   : > { %v6162_v46 = vadd.f32 %v1878_v33, %v1639_v60  ;;  %v1642_v42 = vadd.f32 %v4712_v34, %v5970_v59  ;;  %v1888_v15 = vpop.f32.mrf.mxu0 }
 0x13e   : > { %v1498_v58 = vpop.f32.mrf.mxu1 }
 0x13f   : > { %v6165_v28 = vadd.f32 %v4762_v39, %v1642_v42  ;;  %v1641_v1 = vadd.f32 %v1498_v58, %v5977_v25  ;;  %v4765_v41 = vpop.f32.mrf.mxu0 }
 0x140   : > { %v4715_v56 = vpop.f32.mrf.mxu1 }
 0x141   : > { %v6168_v8 = vadd.f32 %v1888_v15, %v1641_v1  ;;  %v1644_v38 = vadd.f32 %v4715_v56, %v5985_v4  ;;  %v1898_v22 = vpop.f32.mrf.mxu0 }
 0x142   : > { %v1508_v37 = vpop.f32.mrf.mxu1 }
 0x143   : > { %v6171_v27 = vadd.f32 %v4765_v41, %v1644_v38  ;;  %v1643_v54 = vadd.f32 %v1508_v37, %v5991_v2  ;;  %v4768_v59 = vpop.f32.mrf.mxu0 }
 0x144   : > { %v4718_v29 = vpop.f32.mrf.mxu1 }
 0x145   : > { %v6174_v30 = vadd.f32 %v1898_v22, %v1643_v54  ;;  %v1646_v44 = vadd.f32 %v4718_v29, %v5999_v20  ;;  %v1908_v25 = vpop.f32.mrf.mxu0 }
 0x146   : > { %v1518_v16 = vpop.f32.mrf.mxu1 }
 0x147   : > { %v6177_v17 = vadd.f32 %v4768_v59, %v1646_v44  ;;  %v1645_v52 = vadd.f32 %v1518_v16, %v6005_v10  ;;  %v4771_v4 = vpop.f32.mrf.mxu0 }
 0x148   : > { %v4721_v6 = vpop.f32.mrf.mxu1 }
 0x149   : > { %v6180_v55 = vadd.f32 %v1908_v25, %v1645_v52  ;;  %v1648_v47 = vadd.f32 %v4721_v6, %v6013_v24  ;;  %v1918_v2 = vpop.f32.mrf.mxu0 }
 0x14a   : > { %v1528_v57 = vpop.f32.mrf.mxu1 }
 0x14b   : > { %v6183_v14 = vadd.f32 %v4771_v4, %v1648_v47  ;;  %v1647_v49 = vadd.f32 %v1528_v57, %v6019_v7  ;;  %v4774_v20 = vpop.f32.mrf.mxu0 }
 0x14c   : > { %v4724_v21 = vpop.f32.mrf.mxu1 }
 0x14d   : > { %v6186_v51 = vadd.f32 %v1918_v2, %v1647_v49  ;;  %v1650_v62 = vadd.f32 %v4724_v21, %v6027_v61  ;;  %v1928_v10 = vpop.f32.mrf.mxu0 }
 0x14e   : > { %v1538_v33 = vpop.f32.mrf.mxu1 }
 0x14f   : > { %v6189_v60 = vadd.f32 %v4774_v20, %v1650_v62  ;;  %v1649_v34 = vadd.f32 %v1538_v33, %v6033_v12  ;;  %v4777_v24 = vpop.f32.mrf.mxu0 }
 0x150   : > { %v4727_v39 = vpop.f32.mrf.mxu1 }
 0x151   : > { %v6192_v42 = vadd.f32 %v1928_v10, %v1649_v34  ;;  %v1652_v58 = vadd.f32 %v4727_v39, %v6041_v13  ;;  %v1938_v7 = vpop.f32.mrf.mxu0 }
 0x152   : > { %v1548_v15 = vpop.f32.mrf.mxu1 }
 0x153   : > { %v6195_v1 = vadd.f32 %v4777_v24, %v1652_v58  ;;  %v1651_v56 = vadd.f32 %v1548_v15, %v6047_v40  ;;  %v4780_v61 = vpop.f32.mrf.mxu0 }
 0x154   : > { %v4730_v41 = vpop.f32.mrf.mxu1 }
 0x155   : > { %v6198_v38 = vadd.f32 %v1938_v7, %v1651_v56  ;;  %v1654_v37 = vadd.f32 %v4730_v41, %v6055_v19  ;;  %v1948_v12 = vpop.f32.mrf.mxu0 }
 0x156   : > { %v1558_v22 = vpop.f32.mrf.mxu1 }
 0x157   : > { %v6201_v54 = vadd.f32 %v4780_v61, %v1654_v37  ;;  %v1653_v29 = vadd.f32 %v1558_v22, %v6061_v43  ;;  %v4783_v13 = vpop.f32.mrf.mxu0 }
 0x158   : > { %v4733_v59 = vpop.f32.mrf.mxu1 }
 0x159   : > { %v6204_v44 = vadd.f32 %v1948_v12, %v1653_v29  ;;  %v1656_v16 = vadd.f32 %v4733_v59, %v6069_v48  ;;  %v1958_v40 = vpop.f32.mrf.mxu0 }
 0x15a   : > { %v1568_v25 = vpop.f32.mrf.mxu1 }
 0x15b   : > { %v6207_v52 = vadd.f32 %v4783_v13, %v1656_v16  ;;  %v1655_v6 = vadd.f32 %v1568_v25, %v6075_v53  ;;  %v4786_v19 = vpop.f32.mrf.mxu0 }
 0x15c   : > { %v4736_v4 = vpop.f32.mrf.mxu1 }
 0x15d   : > { %6694 = vst [vmem:[#allocation13_spill] sm:$0xff] %v6207_v52  ;;  %v6210_v47 = vadd.f32 %v1958_v40, %v1655_v6  ;;  %v1658_v57 = vadd.f32 %v4736_v4, %v6083_v26  ;;  %v1968_v43 = vpop.f32.mrf.mxu0 }
 0x15e   : > { %v1578_v2 = vpop.f32.mrf.mxu1 }
 0x15f   : > { %6695 = vst [vmem:[#allocation14_spill] sm:$0xff] %v6210_v47  ;;  %v6213_v49 = vadd.f32 %v4786_v19, %v1658_v57  ;;  %v1657_v21 = vadd.f32 %v1578_v2, %v6089_v63  ;;  %v4789_v48 = vpop.f32.mrf.mxu0 }
 0x160   : > { %v4739_v20 = vpop.f32.mrf.mxu1 }
 0x161   : > { %6696 = vst [vmem:[#allocation15_spill] sm:$0xff] %v6213_v49  ;;  %v6216_v62 = vadd.f32 %v1968_v43, %v1657_v21  ;;  %v1660_v33 = vadd.f32 %v4739_v20, %v6098_v36  ;;  %v1978_v53 = vpop.f32.mrf.mxu0 }
 0x162   : > { %v1588_v10 = vpop.f32.mrf.mxu1 }
 0x163   : > { %6697 = vst [vmem:[#allocation16_spill] sm:$0xff] %v6216_v62  ;;  %v6219_v34 = vadd.f32 %v4789_v48, %v1660_v33  ;;  %v1659_v39 = vadd.f32 %v1588_v10, %v6104_v50  ;;  %v4792_v26 = vpop.f32.mrf.mxu0 }
 0x164   : > { %v4742_v24 = vpop.f32.mrf.mxu1 }
 0x165   : > { %6698 = vst [vmem:[#allocation17_spill] sm:$0xff] %v6219_v34  ;;  %v6222_v58 = vadd.f32 %v1978_v53, %v1659_v39  ;;  %v1662_v15 = vadd.f32 %v4742_v24, %v6111_v45  ;;  %v1988_v63 = vpop.f32.mrf.mxu0 }
 0x166   : > { %v1598_v7 = vpop.f32.mrf.mxu1 }
 0x167   : > { %6699 = vst [vmem:[#allocation18_spill] sm:$0xff] %v6222_v58  ;;  %v6225_v56 = vadd.f32 %v4792_v26, %v1662_v15  ;;  %v1661_v41 = vadd.f32 %v1598_v7, %v6116_v31  ;;  %v4795_v36 = vpop.f32.mrf.mxu0 }
 0x168   : > { %v4745_v61 = vpop.f32.mrf.mxu1 }
 0x169   : > { %6700 = vst [vmem:[#allocation19_spill] sm:$0xff] %v6225_v56  ;;  %v6228_v37 = vadd.f32 %v1988_v63, %v1661_v41  ;;  %v1664_v22 = vadd.f32 %v4745_v61, %v6125_v0  ;;  %v1998_v50 = vpop.f32.mrf.mxu0 }
 0x16a   : > { %v1608_v12 = vpop.f32.mrf.mxu1 }
 0x16b   : > { %6701 = vst [vmem:[#allocation20_spill] sm:$0xff] %v6228_v37  ;;  %v6231_v29 = vadd.f32 %v4795_v36, %v1664_v22  ;;  %v1663_v59 = vadd.f32 %v1608_v12, %v6132_v5  ;;  %v4798_v45 = vpop.f32.mrf.mxu0 }
 0x16c   : > { %v4748_v13 = vpop.f32.mrf.mxu1 }
 0x16d   : > { %6702 = vst [vmem:[#allocation21_spill] sm:$0xff] %v6231_v29  ;;  %v6234_v16 = vadd.f32 %v1998_v50, %v1663_v59  ;;  %v1666_v25 = vadd.f32 %v4748_v13, %v6139_v35  ;;  %v2008_v31 = vpop.f32.mrf.mxu0 }
 0x16e   : > { %v1618_v40 = vpop.f32.mrf.mxu1 }
 0x16f   : > { %6703 = vst [vmem:[#allocation22_spill] sm:$0xff] %v6234_v16  ;;  %v6237_v6 = vadd.f32 %v4798_v45, %v1666_v25  ;;  %v1665_v4 = vadd.f32 %v1618_v40, %v6144_v3  ;;  %v4801_v0 = vpop.f32.mrf.mxu0 }
 0x170   : > { %v4751_v19 = vpop.f32.mrf.mxu1 }
 0x171   : > { %6704 = vst [vmem:[#allocation23_spill] sm:$0xff] %v6237_v6  ;;  %v6240_v57 = vadd.f32 %v2008_v31, %v1665_v4  ;;  %v1668_v2 = vadd.f32 %v4751_v19, %v6147_v9  ;;  %v2018_v5 = vpop.f32.mrf.mxu0 }
 0x172   : > { %v1628_v43 = vpop.f32.mrf.mxu1 }
 0x173   : > { %6705 = vst [vmem:[#allocation24_spill] sm:$0xff] %v6240_v57  ;;  %v6243_v21 = vadd.f32 %v4801_v0, %v1668_v2  ;;  %v1667_v20 = vadd.f32 %v1628_v43, %v6150_v18  ;;  %v6246_v35 = vpop.f32.mrf.mxu0 }
 0x174   : > { %v4806_v48 = vpop.f32.mrf.mxu1 }
 0x175   : > { %6706 = vst [vmem:[#allocation25_spill] sm:$0xff] %v6243_v21  ;;  %v6248_v33 = vadd.f32 %v2018_v5, %v1667_v20  ;;  %v6250_v53 = vpop.f32.mrf.mxu0 }
 0x176   : > { %v2258_v10 = vpop.f32.mrf.mxu1 }
 0x177   : > { %6707 = vst [vmem:[#allocation26_spill] sm:$0xff] %v6248_v33  ;;  %v6254_v39 = vpop.f32.mrf.mxu0 }
 0x178   : > { %v6252_v3 = vpop.f32.mrf.mxu1 }
 0x179   : > { %v6258_v9 = vpop.f32.mrf.mxu0 }
 0x17a   : > { %v6256_v24 = vpop.f32.mrf.mxu1 }
 0x17b   : > { %v6262_v15 = vpop.f32.mrf.mxu0 }
 0x17c   : > { %v6260_v26 = vpop.f32.mrf.mxu1 }
 0x17d   : > { %v6266_v7 = vpop.f32.mrf.mxu0 }
 0x17e   : > { %v6264_v18 = vpop.f32.mrf.mxu1 }
 0x17f   : > { %v6270_v41 = vpop.f32.mrf.mxu0 }
 0x180   : > { %v6268_v63 = vpop.f32.mrf.mxu1 }
 0x181   : > { %v6274_v36 = vpop.f32.mrf.mxu0 }
 0x182   : > { %v6272_v61 = vpop.f32.mrf.mxu1 }
 0x183   : > { %v6278_v12 = vpop.f32.mrf.mxu0 }
 0x184   : > { %v6276_v22 = vpop.f32.mrf.mxu1 }
 0x185   : > { %v6282_v59 = vpop.f32.mrf.mxu0 }
 0x186   : > { %v6280_v50 = vpop.f32.mrf.mxu1 }
 0x187   : > { %v6286_v45 = vpop.f32.mrf.mxu0 }
 0x188   : > { %v6284_v13 = vpop.f32.mrf.mxu1 }
 0x189   : > { %v6290_v40 = vpop.f32.mrf.mxu0 }
 0x18a   : > { %v6288_v25 = vpop.f32.mrf.mxu1 }
 0x18b   : > { %v6294_v4 = vpop.f32.mrf.mxu0 }
 0x18c   : > { %v6292_v31 = vpop.f32.mrf.mxu1 }
 0x18d   : > { %v6298_v0 = vpop.f32.mrf.mxu0 }
 0x18e   : > { %v6296_v19 = vpop.f32.mrf.mxu1 }
 0x18f   : > { %v6302_v43 = vpop.f32.mrf.mxu0 }
 0x190   : > { %v6300_v2 = vpop.f32.mrf.mxu1 }
 0x191   : > { %v6306_v20 = vpop.f32.mrf.mxu0 }
 0x192   : > { %v6304_v5 = vpop.f32.mrf.mxu1 }
 0x193   : > { %v6310_v21 = vpop.f32.mrf.mxu0 }
 0x194   : > { %v6308_v33 = vpop.f32.mrf.mxu1 }
 0x195   : > { %v6314_v6 = vpop.f32.mrf.mxu0 }
 0x196   : > { %v6312_v57 = vpop.f32.mrf.mxu1  ;;  %6708 = vst [vmem:[#allocation27_spill] sm:$0xff] %v6314_v6 }
 0x197   : > { %v6318_v29 = vpop.f32.mrf.mxu0 }
 0x198   : > { %v6316_v16 = vpop.f32.mrf.mxu1  ;;  %6710 = vst [vmem:[#allocation29_spill] sm:$0xff] %v6318_v29 }
 0x199   : > { %6709 = vst [vmem:[#allocation28_spill] sm:$0xff] %v6316_v16  ;;  %v6322_v56 = vpop.f32.mrf.mxu0 }
 0x19a   : > { %v6320_v37 = vpop.f32.mrf.mxu1  ;;  %6712 = vst [vmem:[#allocation32_spill] sm:$0xff] %v6322_v56 }
 0x19b   : > { %6711 = vst [vmem:[#allocation31_spill] sm:$0xff] %v6320_v37  ;;  %v6326_v34 = vpop.f32.mrf.mxu0 }
 0x19c   : > { %v6324_v58 = vpop.f32.mrf.mxu1  ;;  %6714 = vst [vmem:[#allocation3_spill] sm:$0xff] %v6326_v34 }
 0x19d   : > { %6713 = vst [vmem:[#allocation30_spill] sm:$0xff] %v6324_v58  ;;  %v6330_v49 = vpop.f32.mrf.mxu0 }
 0x19e   : > { %v6328_v62 = vpop.f32.mrf.mxu1  ;;  %6716 = vst [vmem:[#allocation5_spill] sm:$0xff] %v6330_v49 }
 0x19f   : > { %6715 = vst [vmem:[#allocation4_spill] sm:$0xff] %v6328_v62  ;;  %v6334_v52 = vpop.f32.mrf.mxu0 }
 0x1a0   : > { %v6332_v47 = vpop.f32.mrf.mxu1  ;;  %6718 = vst [vmem:[#allocation7_spill] sm:$0xff] %v6334_v52 }
 0x1a1   : > { %6717 = vst [vmem:[#allocation33_spill] sm:$0xff] %v6332_v47  ;;  %v6338_v16 = vpop.f32.mrf.mxu0 }
 0x1a2   : > { %v6336_v6 = vpop.f32.mrf.mxu1  ;;  %6720 = vst [vmem:[#allocation2_spill] sm:$0xff] %v6338_v16 }
 0x1a3   : > { %6719 = vst [vmem:[#allocation6_spill] sm:$0xff] %v6336_v6  ;;  %v6342_v37 = vpop.f32.mrf.mxu0 }
 0x1a4   : > { %v6340_v29 = vpop.f32.mrf.mxu1  ;;  %6722 = vst [vmem:[#allocation8_spill] sm:$0xff] %v6342_v37 }
 0x1a5   : > { %6721 = vst [vmem:[#allocation9_spill] sm:$0xff] %v6340_v29  ;;  %v6346_v58 = vpop.f32.mrf.mxu0 }
 0x1a6   : > { %v6344_v56 = vpop.f32.mrf.mxu1  ;;  %6724 = vst [vmem:[#allocation11_spill] sm:$0xff] %v6346_v58 }
 0x1a7   : > { %6723 = vst [vmem:[#allocation10_spill] sm:$0xff] %v6344_v56  ;;  %v6350_v62 = vpop.f32.mrf.mxu0  ;;  %v2418_v56 = vadd.f32 %v4806_v48, %v6153_v32  ;;  %v2419_v32 = vadd.f32 %v6256_v24, %v6162_v46 }
 0x1a8   : > { %v6348_v34 = vpop.f32.mrf.mxu1  ;;  %6726 = vst [vmem:[#allocation34_spill] sm:$0xff] %v6350_v62  ;;  %v2417_v62 = vadd.f32 %v2258_v10, %v6156_v11  ;;  %v2422_v11 = vadd.f32 %v6260_v26, %v6165_v28  ;;  %v6386_v10 = vld [vmem:[%s6546_s2] ss:$0 sm:$0xff] }
 0x1a9   : > { %6725 = vst [vmem:[#allocation12_spill] sm:$0xff] %v6348_v34  ;;  %v6354_v47 = vpop.f32.mrf.mxu0 }
 0x1aa   : > { %v6352_v49 = vpop.f32.mrf.mxu1  ;;  %6728 = vst [vmem:[#allocation36_spill] sm:$0xff] %v6354_v47 }
 0x1ab   : > { %6727 = vst [vmem:[#allocation35_spill] sm:$0xff] %v6352_v49  ;;  %v6358_v6 = vpop.f32.mrf.mxu0 }
 0x1ac   : > { %v6356_v52 = vpop.f32.mrf.mxu1  ;;  %6730 = vst [vmem:[#allocation38_spill] sm:$0xff] %v6358_v6  ;;  %v2420_v6 = vadd.f32 %v6252_v3, %v6159_v23 }
 0x1ad   : > { %6729 = vst [vmem:[#allocation37_spill] sm:$0xff] %v6356_v52  ;;  %v6362_v37 = vpop.f32.mrf.mxu0  ;;  %v2809_v52 = vadd.f32 %v6246_v35, %v2418_v56 }
 0x1ae   : > { %v6360_v16 = vpop.f32.mrf.mxu1  ;;  %6732 = vst [vmem:[#allocation40_spill] sm:$0xff] %v6362_v37  ;;  %v2808_v37 = vadd.f32 %v6250_v53, %v2417_v62  ;;  %v2811_v23 = vadd.f32 %v6254_v39, %v2420_v6  ;;  %v2421_v62 = vadd.f32 %v6264_v18, %v6168_v8  ;;  %v2424_v8 = vadd.f32 %v6268_v63, %v6171_v27 }
 0x1af   : > { %6731 = vst [vmem:[#allocation39_spill] sm:$0xff] %v6360_v16  ;;  %v6367_v34 = vpop.f32.mrf.mxu0  ;;  %v2426_v27 = vadd.f32 %v6276_v22, %v6177_v17 }
 0x1b0   : > { %v6365_v58 = vpop.f32.mrf.mxu1 }
 0x1b1   : > { %v6372_v47 = vpop.f32.mrf.mxu0 }
 0x1b2   : > { %v6370_v49 = vpop.f32.mrf.mxu1  ;;  %6733 = vst [vmem:[#allocation41_spill] sm:$0xff] %v6372_v47 }
 0x1b3   : > { %v4956_v29 = vpop.f32.mrf.mxu0 }
 0x1b4   : > { %v4906_v16 = vpop.f32.mrf.mxu1 }
 0x1b5   : > { %v3199_v48 = vadd.f32 %v4906_v16, %v2809_v52  ;;  %v3429_v35 = vpop.f32.mrf.mxu0  ;;  %v2810_v52 = vadd.f32 %v6258_v9, %v2419_v32  ;;  %v2812_v9 = vadd.f32 %v6266_v7, %v2421_v62 }
 0x1b6   : > { %v3039_v56 = vpop.f32.mrf.mxu1 }
 0x1b7   : > { %v3589_v3 = vadd.f32 %v4956_v29, %v3199_v48  ;;  %v3198_v47 = vadd.f32 %v3039_v56, %v2808_v37  ;;  %v4959_v28 = vpop.f32.mrf.mxu0  ;;  %v2813_v37 = vadd.f32 %v6262_v15, %v2422_v11 }
 0x1b8   : > { %v4909_v46 = vpop.f32.mrf.mxu1 }
 0x1b9   : > { %v3628_v16 = vadd.f32 %v6386_v10, %v3589_v3  ;;  %v3588_v53 = vadd.f32 %v3429_v35, %v3198_v47  ;;  %v3201_v6 = vadd.f32 %v4909_v46, %v2811_v23  ;;  %v3439_v39 = vpop.f32.mrf.mxu0  ;;  %v2423_v47 = vadd.f32 %v6272_v61, %v6174_v30 }
 0x1ba   : > { %v3049_v29 = vpop.f32.mrf.mxu1  ;;  %v2815_v23 = vadd.f32 %v6270_v41, %v2424_v8  ;;  %v2425_v30 = vadd.f32 %v6280_v50, %v6180_v55  ;;  %v2817_v41 = vadd.f32 %v6278_v12, %v2426_v27  ;;  %v2427_v8 = vadd.f32 %v6288_v25, %v6186_v51 }
 0x1bb   : > { %3660 = vst [vmem:[%s6394_s13 + $0x8] sm:$0xff] %v3628_v16  ;;  %v3627_v24 = vadd.f32 %v6386_v10, %v3588_v53  ;;  %v3591_v26 = vadd.f32 %v4959_v28, %v3201_v6  ;;  %v3200_v18 = vadd.f32 %v3049_v29, %v2810_v52  ;;  %v4962_v48 = vpop.f32.mrf.mxu0  ;;  %v2814_v28 = vadd.f32 %v6274_v36, %v2423_v47 }
 0x1bc   : > { %v4912_v32 = vpop.f32.mrf.mxu1  ;;  %v2428_v6 = vadd.f32 %v6284_v13, %v6183_v14  ;;  %v2816_v36 = vadd.f32 %v6282_v59, %v2425_v30  ;;  %v2430_v14 = vadd.f32 %v6292_v31, %v6189_v60  ;;  %v2429_v51 = vadd.f32 %v6296_v19, %v6192_v42 }
 0x1bd   : > { %3659 = vst [vmem:[%s6394_s13] sm:$0xff] %v3627_v24  ;;  %v3630_v15 = vadd.f32 %v6386_v10, %v3591_v26  ;;  %v3590_v11 = vadd.f32 %v3439_v39, %v3200_v18  ;;  %v3203_v56 = vadd.f32 %v4912_v32, %v2813_v37  ;;  %v3449_v35 = vpop.f32.mrf.mxu0 }
 0x1be   : > { %v3059_v63 = vpop.f32.mrf.mxu1 }
 0x1bf   : > { %3662 = vst [vmem:[%s6394_s13 + $0x18] sm:$0xff] %v3630_v15  ;;  %v3629_v7 = vadd.f32 %v6386_v10, %v3590_v11  ;;  %v3593_v3 = vadd.f32 %v4962_v48, %v3203_v56  ;;  %v3202_v62 = vadd.f32 %v3059_v63, %v2812_v9  ;;  %v4965_v46 = vpop.f32.mrf.mxu0  ;;  %v2819_v9 = vadd.f32 %v6286_v45, %v2428_v6  ;;  %v6734_v6 = vld [vmem:[#allocation13_spill] sm:$0xff] }
 0x1c0   : > { %v4915_v61 = vpop.f32.mrf.mxu1  ;;  %v2818_v15 = vadd.f32 %v6290_v40, %v2427_v8  ;;  %v2821_v45 = vadd.f32 %v6294_v4, %v2430_v14  ;;  %v2432_v63 = vadd.f32 %v6300_v2, %v6195_v1  ;;  %v2820_v40 = vadd.f32 %v6298_v0, %v2429_v51  ;;  %v6737_v8 = vld [vmem:[#allocation14_spill] sm:$0xff] }
 0x1c1   : > { %3661 = vst [vmem:[%s6394_s13 + $0x10] sm:$0xff] %v3629_v7  ;;  %v3632_v17 = vadd.f32 %v6386_v10, %v3593_v3  ;;  %v3592_v22 = vadd.f32 %v3449_v35, %v3202_v62  ;;  %v3205_v52 = vadd.f32 %v4915_v61, %v2815_v23  ;;  %v3459_v53 = vpop.f32.mrf.mxu0  ;;  %v2431_v3 = vadd.f32 %v6304_v5, %v6198_v38 }
 0x1c2   : > { %v3069_v16 = vpop.f32.mrf.mxu1  ;;  %v2434_v1 = vadd.f32 %v6308_v33, %v6201_v54  ;;  %v2433_v38 = vadd.f32 %v6312_v57, %v6204_v44 }
 0x1c3   : > { %3664 = vst [vmem:[%s6394_s13 + $0x28] sm:$0xff] %v3632_v17  ;;  %v3631_v55 = vadd.f32 %v6386_v10, %v3592_v22  ;;  %v3595_v50 = vadd.f32 %v4965_v46, %v3205_v52  ;;  %v3204_v37 = vadd.f32 %v3069_v16, %v2814_v28  ;;  %v4968_v39 = vpop.f32.mrf.mxu0  ;;  %v2823_v46 = vadd.f32 %v6302_v43, %v2432_v63 }
 0x1c4   : > { %v4918_v29 = vpop.f32.mrf.mxu1  ;;  %v2822_v52 = vadd.f32 %v6306_v20, %v2431_v3  ;;  %v2825_v43 = vadd.f32 %v6310_v21, %v2434_v1  ;;  %v6736_v20 = vld [vmem:[#allocation27_spill] sm:$0xff] }
 0x1c5   : > { %3663 = vst [vmem:[%s6394_s13 + $0x20] sm:$0xff] %v3631_v55  ;;  %v3634_v12 = vadd.f32 %v6386_v10, %v3595_v50  ;;  %v3594_v24 = vadd.f32 %v3459_v53, %v3204_v37  ;;  %v3207_v26 = vadd.f32 %v4918_v29, %v2817_v41  ;;  %v3469_v18 = vpop.f32.mrf.mxu0  ;;  %v6735_v55 = vld [vmem:[#allocation28_spill] sm:$0xff] }
 0x1c6   : > { %v3079_v13 = vpop.f32.mrf.mxu1  ;;  %v2436_v50 = vadd.f32 %v6735_v55, %v6734_v6  ;;  %v6753_v55 = vld [vmem:[#allocation7_spill] sm:$0xff] }
 0x1c7   : > { %3666 = vst [vmem:[%s6394_s13 + $0x38] sm:$0xff] %v3634_v12  ;;  %v3633_v59 = vadd.f32 %v6386_v10, %v3594_v24  ;;  %v3597_v32 = vadd.f32 %v4968_v39, %v3207_v26  ;;  %v3206_v48 = vadd.f32 %v3079_v13, %v2816_v36  ;;  %v4971_v47 = vpop.f32.mrf.mxu0  ;;  %v2824_v36 = vadd.f32 %v6736_v20, %v2433_v38  ;;  %v6738_v12 = vld [vmem:[#allocation31_spill] sm:$0xff]  ;;  %v6749_v38 = vld [vmem:[#allocation18_spill] sm:$0xff]  ;;  %v6754_v20 = vld [vmem:[#allocation20_spill] sm:$0xff] }
 0x1c8   : > { %v4921_v25 = vpop.f32.mrf.mxu1  ;;  %v2435_v24 = vadd.f32 %v6738_v12, %v6737_v8  ;;  %v6739_v13 = vld [vmem:[#allocation15_spill] sm:$0xff]  ;;  %v6756_v12 = vld [vmem:[#allocation2_spill] sm:$0xff] }
 0x1c9   : > { %3665 = vst [vmem:[%s6394_s13 + $0x30] sm:$0xff] %v3633_v59  ;;  %v3636_v60 = vadd.f32 %v6386_v10, %v3597_v32  ;;  %v3596_v31 = vadd.f32 %v3469_v18, %v3206_v48  ;;  %v3209_v11 = vadd.f32 %v4921_v25, %v2819_v9  ;;  %v3479_v27 = vpop.f32.mrf.mxu0  ;;  %v6740_v18 = vld [vmem:[#allocation30_spill] sm:$0xff]  ;;  %v6741_v48 = vld [vmem:[#allocation29_spill] sm:$0xff] }
 0x1ca   : > { %v3089_v56 = vpop.f32.mrf.mxu1  ;;  %v2438_v9 = vadd.f32 %v6740_v18, %v6739_v13  ;;  %v2827_v51 = vadd.f32 %v6741_v48, %v2436_v50  ;;  %v6757_v13 = vld [vmem:[#allocation8_spill] sm:$0xff] }
 0x1cb   : > { %3668 = vst [vmem:[%s6394_s13 + $0x48] sm:$0xff] %v3636_v60  ;;  %v3635_v42 = vadd.f32 %v6386_v10, %v3596_v31  ;;  %v3599_v19 = vadd.f32 %v4971_v47, %v3209_v11  ;;  %v3208_v35 = vadd.f32 %v3089_v56, %v2818_v15  ;;  %v4974_v7 = vpop.f32.mrf.mxu0  ;;  %v6742_v60 = vld [vmem:[#allocation16_spill] sm:$0xff] }
 0x1cc   : > { %v4924_v23 = vpop.f32.mrf.mxu1  ;;  %v6743_v31 = vld [vmem:[#allocation4_spill] sm:$0xff] }
 0x1cd   : > { %3667 = vst [vmem:[%s6394_s13 + $0x40] sm:$0xff] %v3635_v42  ;;  %v3638_v4 = vadd.f32 %v6386_v10, %v3599_v19  ;;  %v3598_v62 = vadd.f32 %v3479_v27, %v3208_v35  ;;  %v3211_v30 = vadd.f32 %v4924_v23, %v2821_v45  ;;  %v3489_v61 = vpop.f32.mrf.mxu0  ;;  %v2437_v11 = vadd.f32 %v6743_v31, %v6742_v60  ;;  %v6744_v27 = vld [vmem:[#allocation32_spill] sm:$0xff]  ;;  %v6760_v60 = vld [vmem:[#allocation11_spill] sm:$0xff] }
 0x1ce   : > { %v3099_v2 = vpop.f32.mrf.mxu1  ;;  %v2826_v63 = vadd.f32 %v6744_v27, %v2435_v24  ;;  %v6759_v48 = vld [vmem:[#allocation12_spill] sm:$0xff]  ;;  %v6762_v27 = vld [vmem:[#allocation35_spill] sm:$0xff] }
 0x1cf   : > { %3670 = vst [vmem:[%s6394_s13 + $0x58] sm:$0xff] %v3638_v4  ;;  %v3637_v0 = vadd.f32 %v6386_v10, %v3598_v62  ;;  %v3601_v28 = vadd.f32 %v4974_v7, %v3211_v30  ;;  %v3210_v17 = vadd.f32 %v3099_v2, %v2820_v40  ;;  %v4977_v22 = vpop.f32.mrf.mxu0  ;;  %v6745_v40 = vld [vmem:[#allocation3_spill] sm:$0xff]  ;;  %v6746_v4 = vld [vmem:[#allocation17_spill] sm:$0xff] }
 0x1d0   : > { %v4927_v5 = vpop.f32.mrf.mxu1  ;;  %v2829_v23 = vadd.f32 %v6745_v40, %v2438_v9  ;;  %v6747_v62 = vld [vmem:[#allocation33_spill] sm:$0xff]  ;;  %v6763_v40 = vld [vmem:[#allocation23_spill] sm:$0xff] }
 0x1d1   : > { %3669 = vst [vmem:[%s6394_s13 + $0x50] sm:$0xff] %v3637_v0  ;;  %v3640_v54 = vadd.f32 %v6386_v10, %v3601_v28  ;;  %v3600_v33 = vadd.f32 %v3489_v61, %v3210_v17  ;;  %v3213_v41 = vadd.f32 %v4927_v5, %v2823_v46  ;;  %v3499_v53 = vpop.f32.mrf.mxu0  ;;  %v2440_v30 = vadd.f32 %v6747_v62, %v6746_v4  ;;  %v6748_v46 = vld [vmem:[#allocation5_spill] sm:$0xff]  ;;  %v6750_v5 = vld [vmem:[#allocation6_spill] sm:$0xff] }
 0x1d2   : > { %v3109_v16 = vpop.f32.mrf.mxu1  ;;  %v2828_v0 = vadd.f32 %v6748_v46, %v2437_v11  ;;  %v6765_v62 = vld [vmem:[#allocation34_spill] sm:$0xff]  ;;  %v6766_v46 = vld [vmem:[#allocation24_spill] sm:$0xff] }
 0x1d3   : > { %3672 = vst [vmem:[%s6394_s13 + $0x68] sm:$0xff] %v3640_v54  ;;  %v3639_v44 = vadd.f32 %v6386_v10, %v3600_v33  ;;  %v3603_v57 = vadd.f32 %v4977_v22, %v3213_v41  ;;  %v3212_v37 = vadd.f32 %v3109_v16, %v2822_v52  ;;  %v4980_v39 = vpop.f32.mrf.mxu0  ;;  %v2439_v22 = vadd.f32 %v6750_v5, %v6749_v38  ;;  %v6751_v41 = vld [vmem:[#allocation19_spill] sm:$0xff]  ;;  %v6768_v5 = vld [vmem:[#allocation36_spill] sm:$0xff] }
 0x1d4   : > { %v4930_v29 = vpop.f32.mrf.mxu1  ;;  %v2831_v50 = vadd.f32 %v6753_v55, %v2440_v30 }
 0x1d5   : > { %3671 = vst [vmem:[%s6394_s13 + $0x60] sm:$0xff] %v3639_v44  ;;  %v3642_v21 = vadd.f32 %v6386_v10, %v3603_v57  ;;  %v3602_v26 = vadd.f32 %v3499_v53, %v3212_v37  ;;  %v3215_v14 = vadd.f32 %v4930_v29, %v2825_v43  ;;  %v3509_v32 = vpop.f32.mrf.mxu0  ;;  %v6752_v43 = vld [vmem:[#allocation9_spill] sm:$0xff]  ;;  %v2830_v24 = vadd.f32 %v6756_v12, %v2439_v22 }
 0x1d6   : > { %v3119_v59 = vpop.f32.mrf.mxu1  ;;  %v2442_v16 = vadd.f32 %v6752_v43, %v6751_v41  ;;  %v6769_v41 = vld [vmem:[#allocation38_spill] sm:$0xff] }
 0x1d7   : > { %3674 = vst [vmem:[%s6394_s13 + $0x78] sm:$0xff] %v3642_v21  ;;  %v3641_v25 = vadd.f32 %v6386_v10, %v3602_v26  ;;  %v3605_v47 = vadd.f32 %v4980_v39, %v3215_v14  ;;  %v3214_v15 = vadd.f32 %v3119_v59, %v2824_v36  ;;  %v4983_v56 = vpop.f32.mrf.mxu0  ;;  %v6755_v36 = vld [vmem:[#allocation10_spill] sm:$0xff] }
 0x1d8   : > { %v4933_v45 = vpop.f32.mrf.mxu1  ;;  %v2441_v29 = vadd.f32 %v6755_v36, %v6754_v20  ;;  %v2833_v18 = vadd.f32 %v6757_v13, %v2442_v16 }
 0x1d9   : > { %3673 = vst [vmem:[%s6394_s13 + $0x70] sm:$0xff] %v3641_v25  ;;  %v3644_v42 = vadd.f32 %v6386_v10, %v3605_v47  ;;  %v3604_v19 = vadd.f32 %v3509_v32, %v3214_v15  ;;  %v3217_v35 = vadd.f32 %v4933_v45, %v2827_v51  ;;  %v3519_v3 = vpop.f32.mrf.mxu0  ;;  %v6758_v32 = vld [vmem:[#allocation21_spill] sm:$0xff] }
 0x1da   : > { %v3129_v7 = vpop.f32.mrf.mxu1  ;;  %v2444_v51 = vadd.f32 %v6759_v48, %v6758_v32  ;;  %v2832_v31 = vadd.f32 %v6760_v60, %v2441_v29 }
 0x1db   : > { %3676 = vst [vmem:[%s6394_s13 + $0x88] sm:$0xff] %v3644_v42  ;;  %v3643_v1 = vadd.f32 %v6386_v10, %v3604_v19  ;;  %v3607_v2 = vadd.f32 %v4983_v56, %v3217_v35  ;;  %v3216_v61 = vadd.f32 %v3129_v7, %v2826_v63  ;;  %v4986_v17 = vpop.f32.mrf.mxu0  ;;  %v6761_v56 = vld [vmem:[#allocation22_spill] sm:$0xff] }
 0x1dc   : > { %v4936_v28 = vpop.f32.mrf.mxu1  ;;  %v2443_v63 = vadd.f32 %v6762_v27, %v6761_v56  ;;  %v2835_v30 = vadd.f32 %v6765_v62, %v2444_v51 }
 0x1dd   : > { %3675 = vst [vmem:[%s6394_s13 + $0x80] sm:$0xff] %v3643_v1  ;;  %v3646_v52 = vadd.f32 %v6386_v10, %v3607_v2  ;;  %v3606_v54 = vadd.f32 %v3519_v3, %v3216_v61  ;;  %v3219_v33 = vadd.f32 %v4936_v28, %v2829_v23  ;;  %v3529_v6 = vpop.f32.mrf.mxu0  ;;  %v6764_v23 = vld [vmem:[#allocation37_spill] sm:$0xff] }
 0x1de   : > { %v3139_v53 = vpop.f32.mrf.mxu1  ;;  %v2446_v7 = vadd.f32 %v6764_v23, %v6763_v40  ;;  %v2834_v22 = vadd.f32 %v6768_v5, %v2443_v63 }
 0x1df   : > { %3678 = vst [vmem:[%s6394_s13 + $0x98] sm:$0xff] %v3646_v52  ;;  %v3645_v44 = vadd.f32 %v6386_v10, %v3606_v54  ;;  %v3609_v57 = vadd.f32 %v4986_v17, %v3219_v33  ;;  %v3218_v37 = vadd.f32 %v3139_v53, %v2828_v0  ;;  %v4989_v8 = vpop.f32.mrf.mxu0  ;;  %v6767_v0 = vld [vmem:[#allocation39_spill] sm:$0xff] }
 0x1e0   : > { %v4939_v39 = vpop.f32.mrf.mxu1  ;;  %v2445_v28 = vadd.f32 %v6767_v0, %v6766_v46  ;;  %v2837_v43 = vadd.f32 %v6769_v41, %v2446_v7 }
 0x1e1   : > { %3677 = vst [vmem:[%s6394_s13 + $0x90] sm:$0xff] %v3645_v44  ;;  %v3648_v21 = vadd.f32 %v6386_v10, %v3609_v57  ;;  %v3608_v26 = vadd.f32 %v3529_v6, %v3218_v37  ;;  %v3221_v14 = vadd.f32 %v4939_v39, %v2831_v50  ;;  %v3539_v59 = vpop.f32.mrf.mxu0  ;;  %v6770_v6 = vld [vmem:[#allocation25_spill] sm:$0xff]  ;;  %v6771_v37 = vld [vmem:[#allocation40_spill] sm:$0xff]  ;;  %v6772_v39 = vld [vmem:[#allocation26_spill] sm:$0xff] }
 0x1e2   : > { %v3149_v9 = vpop.f32.mrf.mxu1  ;;  %v2448_v55 = vadd.f32 %v6365_v58, %v6770_v6  ;;  %v2836_v20 = vadd.f32 %v6771_v37, %v2445_v28 }
 0x1e3   : > { %3680 = vst [vmem:[%s6394_s13 + $0xa8] sm:$0xff] %v3648_v21  ;;  %v3647_v25 = vadd.f32 %v6386_v10, %v3608_v26  ;;  %v3611_v47 = vadd.f32 %v4989_v8, %v3221_v14  ;;  %v3220_v15 = vadd.f32 %v3149_v9, %v2830_v24  ;;  %v4992_v45 = vpop.f32.mrf.mxu0  ;;  %v2447_v8 = vadd.f32 %v6370_v49, %v6772_v39  ;;  %v6773_v49 = vld [vmem:[#allocation41_spill] sm:$0xff] }
 0x1e4   : > { %v4942_v11 = vpop.f32.mrf.mxu1  ;;  %v2839_v14 = vadd.f32 %v6367_v34, %v2448_v55 }
 0x1e5   : > { %3679 = vst [vmem:[%s6394_s13 + $0xa0] sm:$0xff] %v3647_v25  ;;  %v3650_v42 = vadd.f32 %v6386_v10, %v3611_v47  ;;  %v3610_v19 = vadd.f32 %v3539_v59, %v3220_v15  ;;  %v3223_v35 = vadd.f32 %v4942_v11, %v2833_v18  ;;  %v3549_v4 = vpop.f32.mrf.mxu0  ;;  %v2838_v48 = vadd.f32 %v6773_v49, %v2447_v8 }
 0x1e6   : > { %v3159_v3 = vpop.f32.mrf.mxu1 }
 0x1e7   : > { %3682 = vst [vmem:[%s6394_s13 + $0xb8] sm:$0xff] %v3650_v42  ;;  %v3649_v1 = vadd.f32 %v6386_v10, %v3610_v19  ;;  %v3613_v2 = vadd.f32 %v4992_v45, %v3223_v35  ;;  %v3222_v61 = vadd.f32 %v3159_v3, %v2832_v31  ;;  %v4995_v38 = vpop.f32.mrf.mxu0 }
 0x1e8   : > { %v4945_v17 = vpop.f32.mrf.mxu1 }
 0x1e9   : > { %3681 = vst [vmem:[%s6394_s13 + $0xb0] sm:$0xff] %v3649_v1  ;;  %v3652_v52 = vadd.f32 %v6386_v10, %v3613_v2  ;;  %v3612_v54 = vadd.f32 %v3549_v4, %v3222_v61  ;;  %v3225_v33 = vadd.f32 %v4945_v17, %v2835_v30  ;;  %v3559_v53 = vpop.f32.mrf.mxu0 }
 0x1ea   : > { %v3169_v16 = vpop.f32.mrf.mxu1 }
 0x1eb   : > { %3684 = vst [vmem:[%s6394_s13 + $0xc8] sm:$0xff] %v3652_v52  ;;  %v3651_v50 = vadd.f32 %v6386_v10, %v3612_v54  ;;  %v3615_v44 = vadd.f32 %v4995_v38, %v3225_v33  ;;  %v3224_v57 = vadd.f32 %v3169_v16, %v2834_v22  ;;  %v4998_v29 = vpop.f32.mrf.mxu0 }
 0x1ec   : > { %v4948_v36 = vpop.f32.mrf.mxu1 }
 0x1ed   : > { %3683 = vst [vmem:[%s6394_s13 + $0xc0] sm:$0xff] %v3651_v50  ;;  %v3654_v12 = vadd.f32 %v6386_v10, %v3615_v44  ;;  %v3614_v24 = vadd.f32 %v3559_v53, %v3224_v57  ;;  %v3227_v21 = vadd.f32 %v4948_v36, %v2837_v43  ;;  %v3569_v26 = vpop.f32.mrf.mxu0 }
 0x1ee   : > { %v3179_v58 = vpop.f32.mrf.mxu1 }
 0x1ef   : > { %3686 = vst [vmem:[%s6394_s13 + $0xd8] sm:$0xff] %v3654_v12  ;;  %v3653_v13 = vadd.f32 %v6386_v10, %v3614_v24  ;;  %v3617_v18 = vadd.f32 %v4998_v29, %v3227_v21  ;;  %v3226_v9 = vadd.f32 %v3179_v58, %v2836_v20  ;;  %v5001_v32 = vpop.f32.mrf.mxu0 }
 0x1f0   : > { %v4951_v59 = vpop.f32.mrf.mxu1 }
 0x1f1   : > { %3685 = vst [vmem:[%s6394_s13 + $0xd0] sm:$0xff] %v3653_v13  ;;  %v3656_v51 = vadd.f32 %v6386_v10, %v3617_v18  ;;  %v3616_v25 = vadd.f32 %v3569_v26, %v3226_v9  ;;  %v3229_v47 = vadd.f32 %v4951_v59, %v2839_v14  ;;  %v3579_v11 = vpop.f32.mrf.mxu0 }
 0x1f2   : > { %v3189_v15 = vpop.f32.mrf.mxu1 }
 0x1f3   : > { %3688 = vst [vmem:[%s6394_s13 + $0xe8] sm:$0xff] %v3656_v51  ;;  %v3655_v34 = vadd.f32 %v6386_v10, %v3616_v25  ;;  %v3619_v60 = vadd.f32 %v5001_v32, %v3229_v47  ;;  %v3228_v31 = vadd.f32 %v3189_v15, %v2838_v48 }
 0x1f5   : > { %3687 = vst [vmem:[%s6394_s13 + $0xe0] sm:$0xff] %v3655_v34  ;;  %v3658_v45 = vadd.f32 %v6386_v10, %v3619_v60  ;;  %v3618_v56 = vadd.f32 %v3579_v11, %v3228_v31 }
 0x1f7   : > { %3690 = vst [vmem:[%s6394_s13 + $0xf8] sm:$0xff] %v3658_v45  ;;  %v3657_v27 = vadd.f32 %v6386_v10, %v3618_v56 }
 0x1f9   : > { %3689 = vst [vmem:[%s6394_s13 + $0xf0] sm:$0xff] %v3657_v27 }
 0x1fa PF: > { %s13_s12 = sadd.s32 1, %s5019_s12  }
 0x1fb   : > { %p10_p4 = scmp.ge.s32.totalorder %s13_s12, 4  }
 0x1fd   :  { %12 = sbr.rel (!%p10_p4) target bundleno = 1 (0x1), region = 72 }

</bundles_post_ra>
